<compile_context>
chip_gen: v7x
topology: tpu7x:2x2x1
jax: 0.10.0
libtpu: 0.0.40
codegen_flags: <defaults>
</compile_context>

<pallas_src>
from functools import partial

import jax
import jax.numpy as jnp
from jax.experimental import pallas as pl
from jax.experimental.pallas import tpu as pltpu


# -----------------------------------------------------------------------------
# Fused Pallas kernel: upsample + conv0/BN/ReLU + residual + conv1/BN/ReLU
# + residual.  One grid step processes `nb` batch elements (flattened rows).
# -----------------------------------------------------------------------------
def _decoder_block_kernel(x_ref, uh_ref, uwc_ref, w0_ref, b0_ref,
                          w1_ref, b1_ref, out_ref, *, hu):
    # x_ref  : [nb*H, W*C]      f32   rows = (batch, H), cols = (W, C) flattened
    # uh_ref : [nb*2H, nb*H]    bf16  block-diagonal H-axis bilinear matrix
    # uwc_ref: [W*C, 2W*C]      bf16  W-axis bilinear matrix kron'd with I_C
    # w*_ref : [3, 2W*C, 2W*C]  bf16  banded conv weights per H-tap (BN folded)
    # b*_ref : [1, 2W*C]        f32   per-channel bias tiled over W (BN folded)
    # out_ref: [nb*2H, 2W*C]    f32
    # hu     : per-image upsampled height (2H), static.
    f32, bf16 = jnp.float32, jnp.bfloat16

    # bilinear x2 upsample (align_corners=False) as two bf16 matmuls, f32 acc
    x = x_ref[...].astype(bf16)                                      # [nb*H, W*C]
    t = jnp.dot(x, uwc_ref[...], preferred_element_type=f32)        # [nb*H, 2W*C]
    up = jnp.dot(uh_ref[...], t.astype(bf16),
                 preferred_element_type=f32)                        # [nb*2H, 2W*C]

    rows = up.shape[0]
    row_idx = jax.lax.broadcasted_iota(jnp.int32, up.shape, 0)
    top_row = (row_idx % hu) == 0          # r-1 neighbour is outside the image
    bot_row = (row_idx % hu) == hu - 1     # r+1 neighbour is outside the image

    def conv_bn_relu(inp_f32, w_ref, b_ref):
        # 'same' 3x3 conv + folded BN + ReLU, entirely in [rows, 2W*C] layout.
        inp = inp_f32.astype(bf16)
        t0 = jnp.dot(inp, w_ref[0], preferred_element_type=f32)     # H-tap dy=0
        t1 = jnp.dot(inp, w_ref[1], preferred_element_type=f32)     # H-tap dy=1
        t2 = jnp.dot(inp, w_ref[2], preferred_element_type=f32)     # H-tap dy=2
        # +-1 row halo via XLU rotate; zero rows that wrapped across an image
        # (or batch-element) boundary to keep zero-padding semantics.
        t0s = jnp.where(top_row, 0.0, pltpu.roll(t0, shift=1, axis=0))
        t2s = jnp.where(bot_row, 0.0, pltpu.roll(t2, shift=rows - 1, axis=0))
        return jnp.maximum(t1 + t0s + t2s + b_ref[...], 0.0)

    res1_in = conv_bn_relu(up, w0_ref, b0_ref) + up            # res0_out + up
    out = conv_bn_relu(res1_in, w1_ref, b1_ref) + res1_in      # res1_out + res1_in
    out_ref[...] = out.astype(out_ref.dtype)


# -----------------------------------------------------------------------------
# One-time parameter preprocessing (hoisted out of the forward path).
# -----------------------------------------------------------------------------
def _fold_bn(w_oihw, b, gamma, beta, mean, var, eps=1e-5):
    """Fold inference-mode BatchNorm into conv weight/bias (OIHW weight)."""
    s = gamma / jnp.sqrt(var + eps)                    # [Cout]
    return w_oihw * s[:, None, None, None], (b - mean) * s + beta


def _interp_matrix(in_size):
    """[2*in, in] PyTorch bilinear-x2 matrix (align_corners=False, src>=0)."""
    o = jnp.arange(2 * in_size, dtype=jnp.float32)
    src = jnp.maximum((o + 0.5) * 0.5 - 0.5, 0.0)
    i0 = jnp.floor(src).astype(jnp.int32)
    i1 = jnp.minimum(i0 + 1, in_size - 1)
    frac = src - i0.astype(jnp.float32)
    return (jax.nn.one_hot(i0, in_size, dtype=jnp.float32) * (1.0 - frac)[:, None]
            + jax.nn.one_hot(i1, in_size, dtype=jnp.float32) * frac[:, None])


def _band_weights(w_eff, wu):
    """[Cout, Cin, 3, 3] folded weights -> [3, wu*Cin, wu*Cout] banded mats.

    band[dy][wi*Cin+ci, wo*Cout+co] = w_eff[co, ci, dy, wi-wo+1] (0 elsewhere);
    the W zero-padding of the 'same' conv is implicit (out-of-range taps absent).
    """
    cin, cout = w_eff.shape[1], w_eff.shape[0]
    bands = []
    for dy in range(3):
        m = jnp.zeros((wu * cin, wu * cout), jnp.float32)
        for dx in range(3):
            shift = jnp.eye(wu, wu, k=1 - dx, dtype=jnp.float32)
            m = m + jnp.kron(shift, w_eff[:, :, dy, dx].T)
        bands.append(m)
    return jnp.stack(bands, axis=0)


def _pick_batch_block(n, hu, target_rows=128):
    """Batch elements per grid step: aim for >=target_rows matmul rows while
    keeping >=2 grid steps (both v7x TensorCores busy) and nb | n."""
    nb = max(1, min(n, -(-target_rows // hu)))
    while nb > 1 and n // nb < 2:
        nb -= 1
    while n % nb != 0:
        nb -= 1
    return nb


def prepare_decoder_params(w0_eff, b0_eff, w1_eff, b1_eff, *, h, w, nb):
    """Build kernel-ready operands once (banded bf16 weights, interp mats)."""
    c = w0_eff.shape[0]
    wu = 2 * w
    uh = _interp_matrix(h)                                              # [2H, H]
    uh_block = jnp.kron(jnp.eye(nb, dtype=jnp.float32), uh)            # [nb*2H, nb*H]
    uwc = jnp.kron(_interp_matrix(w).T, jnp.eye(c, dtype=jnp.float32))  # [W*C, 2W*C]
    w0b = _band_weights(w0_eff, wu).astype(jnp.bfloat16)
    w1b = _band_weights(w1_eff, wu).astype(jnp.bfloat16)
    b0t = jnp.tile(b0_eff, wu)[None, :].astype(jnp.float32)
    b1t = jnp.tile(b1_eff, wu)[None, :].astype(jnp.float32)
    return (uh_block.astype(jnp.bfloat16), uwc.astype(jnp.bfloat16),
            w0b, b0t, w1b, b1t)


def init_params(key, in_channels, out_channels, k=3):
    assert in_channels == out_channels, "residual add requires Cin == Cout"
    keys = jax.random.split(key, 4)
    c = out_channels
    params = {}
    for idx in range(2):
        cin = in_channels if idx == 0 else out_channels
        scale = 1.0 / (cin * k * k) ** 0.5
        w = jax.random.normal(keys[2 * idx], (c, cin, k, k), jnp.float32) * scale
        b = jax.random.normal(keys[2 * idx + 1], (c,), jnp.float32) * 0.1
        gamma = 1.0 + 0.05 * jnp.arange(c, dtype=jnp.float32)
        beta = 0.02 * jnp.arange(c, dtype=jnp.float32)
        mean = 0.01 * jnp.arange(c, dtype=jnp.float32)
        var = 1.0 + 0.1 * jnp.arange(c, dtype=jnp.float32)
        w_eff, b_eff = _fold_bn(w, b, gamma, beta, mean, var)
        params[f"w{idx}"], params[f"b{idx}"] = w_eff, b_eff
    return params


# -----------------------------------------------------------------------------
# Public wrapper: NCHW in / NCHW out (matches the PyTorch module).
# -----------------------------------------------------------------------------
@partial(jax.jit, static_argnames=("nb",))
def decoder_block(x_nchw, uh_block, uwc, w0b, b0t, w1b, b1t, *, nb=1):
    n, c, h, w = x_nchw.shape
    hu, wu = 2 * h, 2 * w
    wc, wuc = w * c, wu * c
    assert n % nb == 0, (n, nb)
    rows_in, rows_out = nb * h, nb * hu
    grid = (n // nb,)

    # Boundary layout change only (pre-upsample tensor, 4x smaller than output).
    # TODO(synk): downstream consumers that accept NHWC / flat [rows, W*C] can
    #             skip both NCHW<->NHWC transposes entirely.
    x_rows = jnp.transpose(x_nchw, (0, 2, 3, 1)).reshape(n * h, wc)

    def _nbytes(shape, dtype):
        size = 1
        for d in shape:
            size *= int(d)
        return size * jnp.dtype(dtype).itemsize

    operand_bytes = (_nbytes((rows_in, wc), x_nchw.dtype)
                     + _nbytes(uh_block.shape, uh_block.dtype)
                     + _nbytes(uwc.shape, uwc.dtype)
                     + _nbytes(w0b.shape, w0b.dtype)
                     + _nbytes(b0t.shape, b0t.dtype)
                     + _nbytes(w1b.shape, w1b.dtype)
                     + _nbytes(b1t.shape, b1t.dtype)
                     + _nbytes((rows_out, wuc), x_nchw.dtype))
    # double-buffered operands + ~12 live [nb*2H, 2W*C] f32 intermediates
    vmem_limit = int(min(64 * 1024 * 1024,
                         max(16 * 1024 * 1024,
                             2 * operand_bytes + 12 * rows_out * wuc * 4
                             + 2 * 1024 * 1024)))

    out_rows = pl.pallas_call(
        partial(_decoder_block_kernel, hu=hu),
        out_shape=jax.ShapeDtypeStruct((n * hu, wuc), x_nchw.dtype),
        grid_spec=pltpu.PrefetchScalarGridSpec(
            num_scalar_prefetch=0,
            grid=grid,
            in_specs=[
                pl.BlockSpec((rows_in, wc), lambda i: (i, 0)),
                pl.BlockSpec((rows_out, rows_in), lambda i: (0, 0)),
                pl.BlockSpec((wc, wuc), lambda i: (0, 0)),
                pl.BlockSpec((3, wuc, wuc), lambda i: (0, 0, 0)),
                pl.BlockSpec((1, wuc), lambda i: (0, 0)),
                pl.BlockSpec((3, wuc, wuc), lambda i: (0, 0, 0)),
                pl.BlockSpec((1, wuc), lambda i: (0, 0)),
            ],
            out_specs=pl.BlockSpec((rows_out, wuc), lambda i: (i, 0)),
        ),
        compiler_params=pltpu.CompilerParams(
            dimension_semantics=("parallel",),
            vmem_limit_bytes=vmem_limit,
        ),
    )(x_rows, uh_block, uwc, w0b, b0t, w1b, b1t)

    out = out_rows.reshape(n, hu, wu, c)
    return jnp.transpose(out, (0, 3, 1, 2))                 # NHWC -> NCHW


# -----------------------------------------------------------------------------
# Pure-JAX reference (correctness check for the Pallas kernel).
# -----------------------------------------------------------------------------
def _bilinear_up2_ref(x):  # x: [N, H, W, C]
    def up_axis(t, axis):
        size = t.shape[axis]
        i = jnp.arange(2 * size, dtype=jnp.float32)
        src = jnp.maximum((i + 0.5) * 0.5 - 0.5, 0.0)
        i0 = jnp.floor(src).astype(jnp.int32)
        i1 = jnp.minimum(i0 + 1, size - 1)
        frac = src - i0.astype(jnp.float32)
        t0 = jnp.take(t, i0, axis=axis)
        t1 = jnp.take(t, i1, axis=axis)
        shape = [1] * t.ndim
        shape[axis] = 2 * size
        wgt = frac.reshape(shape)
        return t0 * (1.0 - wgt) + t1 * wgt
    return up_axis(up_axis(x, 1), 2)


def _ref_conv_bn_relu(x, w_eff, b_eff):
    w_hwio = jnp.transpose(w_eff, (2, 3, 1, 0))
    y = jax.lax.conv_general_dilated(
        x, w_hwio, window_strides=(1, 1), padding="SAME",
        dimension_numbers=("NHWC", "HWIO", "NHWC"))
    return jnp.maximum(y + b_eff, 0.0)


def decoder_block_ref(x_nchw, w0_eff, b0_eff, w1_eff, b1_eff):
    x = jnp.transpose(x_nchw, (0, 2, 3, 1))
    up = _bilinear_up2_ref(x)
    res1_in = _ref_conv_bn_relu(up, w0_eff, b0_eff) + up
    out = _ref_conv_bn_relu(res1_in, w1_eff, b1_eff) + res1_in
    return jnp.transpose(out, (0, 3, 1, 2))


if __name__ == "__main__":
    key = jax.random.PRNGKey(0)
    kx, kp = jax.random.split(key)

    N, C, H, W = 4, 8, 16, 16            # in_channels == out_channels == 8
    x = jax.random.normal(kx, (N, C, H, W), jnp.float32)
    p = init_params(kp, C, C)

    nb = _pick_batch_block(N, 2 * H)                         # -> 2 (grid of 2)
    prep = prepare_decoder_params(p["w0"], p["b0"], p["w1"], p["b1"],
                                  h=H, w=W, nb=nb)           # one-time prep

    out = decoder_block(x, *prep, nb=nb)
    out = jax.block_until_ready(out)

    ref = decoder_block_ref(x, p["w0"], p["b0"], p["w1"], p["b1"])
    assert out.shape == (N, C, 2 * H, 2 * W), out.shape
    max_err = float(jnp.max(jnp.abs(out - ref)))
    scale = float(jnp.max(jnp.abs(ref))) + 1e-6
    # bf16 matmul inputs with f32 accumulation: relaxed tolerance vs f32 ref.
    assert max_err <= 3e-2 * scale + 2e-2, (max_err, scale)

    print("KERNEL_OK")
</pallas_src>

<mosaic_0001>
module attributes {stable_mosaic.version = 11 : i64} {
  func.func @_decoder_block_kernel(%arg0: i32, %arg1: memref<32x128xf32, #tpu.memory_space<vmem>>, %arg2: memref<64x32xbf16, #tpu.memory_space<vmem>>, %arg3: memref<128x256xbf16, #tpu.memory_space<vmem>>, %arg4: memref<3x256x256xbf16, #tpu.memory_space<vmem>>, %arg5: memref<1x256xf32, #tpu.memory_space<vmem>>, %arg6: memref<3x256x256xbf16, #tpu.memory_space<vmem>>, %arg7: memref<1x256xf32, #tpu.memory_space<vmem>>, %arg8: memref<64x256xf32, #tpu.memory_space<vmem>>) attributes {dimension_semantics = [#tpu.dimension_semantics<parallel>], iteration_bounds = array<i64: 2>, scalar_prefetch = 0 : i64, scratch_operands = 0 : i64, tpu.core_type = #tpu.core_type<tc>, window_params = [{transform_indices = @transform_0, window_bounds = array<i64: 32, 128>}, {pipeline_mode = #tpu.pipeline_mode<synchronous>, transform_indices = @transform_1, window_bounds = array<i64: 64, 32>}, {pipeline_mode = #tpu.pipeline_mode<synchronous>, transform_indices = @transform_2, window_bounds = array<i64: 128, 256>}, {pipeline_mode = #tpu.pipeline_mode<synchronous>, transform_indices = @transform_3, window_bounds = array<i64: 3, 256, 256>}, {pipeline_mode = #tpu.pipeline_mode<synchronous>, transform_indices = @transform_4, window_bounds = array<i64: 1, 256>}, {pipeline_mode = #tpu.pipeline_mode<synchronous>, transform_indices = @transform_5, window_bounds = array<i64: 3, 256, 256>}, {pipeline_mode = #tpu.pipeline_mode<synchronous>, transform_indices = @transform_6, window_bounds = array<i64: 1, 256>}, {transform_indices = @transform_7, window_bounds = array<i64: 64, 256>}]} {
    %c0 = arith.constant 0 : index
    %c0_0 = arith.constant 0 : index
    %0 = vector.load %arg1[%c0, %c0_0] : memref<32x128xf32, #tpu.memory_space<vmem>>, vector<32x128xf32>
    %1 = arith.truncf %0 : vector<32x128xf32> to vector<32x128xbf16>
    %c0_1 = arith.constant 0 : index
    %c0_2 = arith.constant 0 : index
    %2 = vector.load %arg3[%c0_1, %c0_2] : memref<128x256xbf16, #tpu.memory_space<vmem>>, vector<128x256xbf16>
    %cst = arith.constant dense<0.000000e+00> : vector<32x256xf32>
    %3 = tpu.matmul %1, %2, %cst {dimension_numbers = #tpu.dot_dimension_numbers<[1], [0], [0], [1], [0, 0, 1, 1], [], []>} : vector<32x128xbf16>, vector<128x256xbf16>, vector<32x256xf32> -> vector<32x256xf32>
    %c0_3 = arith.constant 0 : index
    %c0_4 = arith.constant 0 : index
    %4 = vector.load %arg2[%c0_3, %c0_4] : memref<64x32xbf16, #tpu.memory_space<vmem>>, vector<64x32xbf16>
    %5 = arith.truncf %3 : vector<32x256xf32> to vector<32x256xbf16>
    %cst_5 = arith.constant dense<0.000000e+00> : vector<64x256xf32>
    %6 = tpu.matmul %4, %5, %cst_5 {dimension_numbers = #tpu.dot_dimension_numbers<[1], [0], [0], [1], [0, 0, 1, 1], [], []>} : vector<64x32xbf16>, vector<32x256xbf16>, vector<64x256xf32> -> vector<64x256xf32>
    %7 = tpu.iota {dimensions = array<i32: 0>} : vector<64x256xi32>
    %c32_i32 = arith.constant 32 : i32
    %c0_i32 = arith.constant 0 : i32
    %8 = arith.cmpi eq, %c32_i32, %c0_i32 : i32
    %c1_i32 = arith.constant 1 : i32
    %9 = arith.select %8, %c1_i32, %c32_i32 : i32
    %10 = vector.broadcast %9 : i32 to vector<64x256xi32>
    %11 = arith.remsi %7, %10 : vector<64x256xi32>
    %c0_i32_6 = arith.constant 0 : i32
    %12 = vector.broadcast %c0_i32_6 : i32 to vector<64x256xi32>
    %13 = arith.cmpi ne, %11, %12 : vector<64x256xi32>
    %c0_i32_7 = arith.constant 0 : i32
    %14 = vector.broadcast %c0_i32_7 : i32 to vector<64x256xi32>
    %15 = arith.cmpi slt, %11, %14 : vector<64x256xi32>
    %c0_i32_8 = arith.constant 0 : i32
    %16 = arith.cmpi slt, %9, %c0_i32_8 : i32
    %17 = vector.broadcast %16 : i1 to vector<64x256xi1>
    %18 = vector.broadcast %17 : vector<64x256xi1> to vector<64x256xi1>
    %19 = arith.xori %15, %18 : vector<64x256xi1>
    %20 = arith.andi %19, %13 : vector<64x256xi1>
    %21 = vector.broadcast %9 : i32 to vector<64x256xi32>
    %22 = arith.addi %11, %21 : vector<64x256xi32>
    %23 = arith.select %20, %22, %11 : vector<64x256xi1>, vector<64x256xi32>
    %c0_i32_9 = arith.constant 0 : i32
    %24 = vector.broadcast %c0_i32_9 : i32 to vector<64x256xi32>
    %25 = arith.cmpi eq, %23, %24 : vector<64x256xi32>
    %c32_i32_10 = arith.constant 32 : i32
    %c0_i32_11 = arith.constant 0 : i32
    %26 = arith.cmpi eq, %c32_i32_10, %c0_i32_11 : i32
    %c1_i32_12 = arith.constant 1 : i32
    %27 = arith.select %26, %c1_i32_12, %c32_i32_10 : i32
    %28 = vector.broadcast %27 : i32 to vector<64x256xi32>
    %29 = arith.remsi %7, %28 : vector<64x256xi32>
    %c0_i32_13 = arith.constant 0 : i32
    %30 = vector.broadcast %c0_i32_13 : i32 to vector<64x256xi32>
    %31 = arith.cmpi ne, %29, %30 : vector<64x256xi32>
    %c0_i32_14 = arith.constant 0 : i32
    %32 = vector.broadcast %c0_i32_14 : i32 to vector<64x256xi32>
    %33 = arith.cmpi slt, %29, %32 : vector<64x256xi32>
    %c0_i32_15 = arith.constant 0 : i32
    %34 = arith.cmpi slt, %27, %c0_i32_15 : i32
    %35 = vector.broadcast %34 : i1 to vector<64x256xi1>
    %36 = vector.broadcast %35 : vector<64x256xi1> to vector<64x256xi1>
    %37 = arith.xori %33, %36 : vector<64x256xi1>
    %38 = arith.andi %37, %31 : vector<64x256xi1>
    %39 = vector.broadcast %27 : i32 to vector<64x256xi32>
    %40 = arith.addi %29, %39 : vector<64x256xi32>
    %41 = arith.select %38, %40, %29 : vector<64x256xi1>, vector<64x256xi32>
    %c31_i32 = arith.constant 31 : i32
    %42 = vector.broadcast %c31_i32 : i32 to vector<64x256xi32>
    %43 = arith.cmpi eq, %41, %42 : vector<64x256xi32>
    %44 = arith.truncf %6 : vector<64x256xf32> to vector<64x256xbf16>
    %c0_16 = arith.constant 0 : index
    %c0_17 = arith.constant 0 : index
    %c0_18 = arith.constant 0 : index
    %45 = vector.load %arg4[%c0_16, %c0_17, %c0_18] : memref<3x256x256xbf16, #tpu.memory_space<vmem>>, vector<1x256x256xbf16>
    %46 = vector.shape_cast %45 : vector<1x256x256xbf16> to vector<256x256xbf16>
    %cst_19 = arith.constant dense<0.000000e+00> : vector<64x256xf32>
    %47 = tpu.matmul %44, %46, %cst_19 {dimension_numbers = #tpu.dot_dimension_numbers<[1], [0], [0], [1], [0, 0, 1, 1], [], []>} : vector<64x256xbf16>, vector<256x256xbf16>, vector<64x256xf32> -> vector<64x256xf32>
    %c1 = arith.constant 1 : index
    %c0_20 = arith.constant 0 : index
    %c0_21 = arith.constant 0 : index
    %48 = vector.load %arg4[%c1, %c0_20, %c0_21] : memref<3x256x256xbf16, #tpu.memory_space<vmem>>, vector<1x256x256xbf16>
    %49 = vector.shape_cast %48 : vector<1x256x256xbf16> to vector<256x256xbf16>
    %cst_22 = arith.constant dense<0.000000e+00> : vector<64x256xf32>
    %50 = tpu.matmul %44, %49, %cst_22 {dimension_numbers = #tpu.dot_dimension_numbers<[1], [0], [0], [1], [0, 0, 1, 1], [], []>} : vector<64x256xbf16>, vector<256x256xbf16>, vector<64x256xf32> -> vector<64x256xf32>
    %c2 = arith.constant 2 : index
    %c0_23 = arith.constant 0 : index
    %c0_24 = arith.constant 0 : index
    %51 = vector.load %arg4[%c2, %c0_23, %c0_24] : memref<3x256x256xbf16, #tpu.memory_space<vmem>>, vector<1x256x256xbf16>
    %52 = vector.shape_cast %51 : vector<1x256x256xbf16> to vector<256x256xbf16>
    %cst_25 = arith.constant dense<0.000000e+00> : vector<64x256xf32>
    %53 = tpu.matmul %44, %52, %cst_25 {dimension_numbers = #tpu.dot_dimension_numbers<[1], [0], [0], [1], [0, 0, 1, 1], [], []>} : vector<64x256xbf16>, vector<256x256xbf16>, vector<64x256xf32> -> vector<64x256xf32>
    %c1_i32_26 = arith.constant 1 : i32
    %54 = tpu.dynamic_rotate %47 by %c1_i32_26 dim 0 : vector<64x256xf32>, i32 -> vector<64x256xf32>
    %cst_27 = arith.constant 0.000000e+00 : f32
    %55 = vector.broadcast %cst_27 : f32 to vector<64x256xf32>
    %56 = arith.select %25, %55, %54 : vector<64x256xi1>, vector<64x256xf32>
    %c63_i32 = arith.constant 63 : i32
    %57 = tpu.dynamic_rotate %53 by %c63_i32 dim 0 : vector<64x256xf32>, i32 -> vector<64x256xf32>
    %cst_28 = arith.constant 0.000000e+00 : f32
    %58 = vector.broadcast %cst_28 : f32 to vector<64x256xf32>
    %59 = arith.select %43, %58, %57 : vector<64x256xi1>, vector<64x256xf32>
    %60 = arith.addf %50, %56 : vector<64x256xf32>
    %61 = arith.addf %60, %59 : vector<64x256xf32>
    %c0_29 = arith.constant 0 : index
    %c0_30 = arith.constant 0 : index
    %62 = vector.load %arg5[%c0_29, %c0_30] : memref<1x256xf32, #tpu.memory_space<vmem>>, vector<1x256xf32>
    %63 = vector.broadcast %62 : vector<1x256xf32> to vector<64x256xf32>
    %64 = arith.addf %61, %63 : vector<64x256xf32>
    %cst_31 = arith.constant 0.000000e+00 : f32
    %65 = vector.broadcast %cst_31 : f32 to vector<64x256xf32>
    %66 = arith.maximumf %64, %65 : vector<64x256xf32>
    %67 = arith.addf %66, %6 : vector<64x256xf32>
    %68 = arith.truncf %67 : vector<64x256xf32> to vector<64x256xbf16>
    %c0_32 = arith.constant 0 : index
    %c0_33 = arith.constant 0 : index
    %c0_34 = arith.constant 0 : index
    %69 = vector.load %arg6[%c0_32, %c0_33, %c0_34] : memref<3x256x256xbf16, #tpu.memory_space<vmem>>, vector<1x256x256xbf16>
    %70 = vector.shape_cast %69 : vector<1x256x256xbf16> to vector<256x256xbf16>
    %cst_35 = arith.constant dense<0.000000e+00> : vector<64x256xf32>
    %71 = tpu.matmul %68, %70, %cst_35 {dimension_numbers = #tpu.dot_dimension_numbers<[1], [0], [0], [1], [0, 0, 1, 1], [], []>} : vector<64x256xbf16>, vector<256x256xbf16>, vector<64x256xf32> -> vector<64x256xf32>
    %c1_36 = arith.constant 1 : index
    %c0_37 = arith.constant 0 : index
    %c0_38 = arith.constant 0 : index
    %72 = vector.load %arg6[%c1_36, %c0_37, %c0_38] : memref<3x256x256xbf16, #tpu.memory_space<vmem>>, vector<1x256x256xbf16>
    %73 = vector.shape_cast %72 : vector<1x256x256xbf16> to vector<256x256xbf16>
    %cst_39 = arith.constant dense<0.000000e+00> : vector<64x256xf32>
    %74 = tpu.matmul %68, %73, %cst_39 {dimension_numbers = #tpu.dot_dimension_numbers<[1], [0], [0], [1], [0, 0, 1, 1], [], []>} : vector<64x256xbf16>, vector<256x256xbf16>, vector<64x256xf32> -> vector<64x256xf32>
    %c2_40 = arith.constant 2 : index
    %c0_41 = arith.constant 0 : index
    %c0_42 = arith.constant 0 : index
    %75 = vector.load %arg6[%c2_40, %c0_41, %c0_42] : memref<3x256x256xbf16, #tpu.memory_space<vmem>>, vector<1x256x256xbf16>
    %76 = vector.shape_cast %75 : vector<1x256x256xbf16> to vector<256x256xbf16>
    %cst_43 = arith.constant dense<0.000000e+00> : vector<64x256xf32>
    %77 = tpu.matmul %68, %76, %cst_43 {dimension_numbers = #tpu.dot_dimension_numbers<[1], [0], [0], [1], [0, 0, 1, 1], [], []>} : vector<64x256xbf16>, vector<256x256xbf16>, vector<64x256xf32> -> vector<64x256xf32>
    %c1_i32_44 = arith.constant 1 : i32
    %78 = tpu.dynamic_rotate %71 by %c1_i32_44 dim 0 : vector<64x256xf32>, i32 -> vector<64x256xf32>
    %cst_45 = arith.constant 0.000000e+00 : f32
    %79 = vector.broadcast %cst_45 : f32 to vector<64x256xf32>
    %80 = arith.select %25, %79, %78 : vector<64x256xi1>, vector<64x256xf32>
    %c63_i32_46 = arith.constant 63 : i32
    %81 = tpu.dynamic_rotate %77 by %c63_i32_46 dim 0 : vector<64x256xf32>, i32 -> vector<64x256xf32>
    %cst_47 = arith.constant 0.000000e+00 : f32
    %82 = vector.broadcast %cst_47 : f32 to vector<64x256xf32>
    %83 = arith.select %43, %82, %81 : vector<64x256xi1>, vector<64x256xf32>
    %84 = arith.addf %74, %80 : vector<64x256xf32>
    %85 = arith.addf %84, %83 : vector<64x256xf32>
    %c0_48 = arith.constant 0 : index
    %c0_49 = arith.constant 0 : index
    %86 = vector.load %arg7[%c0_48, %c0_49] : memref<1x256xf32, #tpu.memory_space<vmem>>, vector<1x256xf32>
    %87 = vector.broadcast %86 : vector<1x256xf32> to vector<64x256xf32>
    %88 = arith.addf %85, %87 : vector<64x256xf32>
    %cst_50 = arith.constant 0.000000e+00 : f32
    %89 = vector.broadcast %cst_50 : f32 to vector<64x256xf32>
    %90 = arith.maximumf %88, %89 : vector<64x256xf32>
    %91 = arith.addf %90, %67 : vector<64x256xf32>
    %c0_51 = arith.constant 0 : index
    %c0_52 = arith.constant 0 : index
    %92 = vector.load %arg8[%c0_51, %c0_52] : memref<64x256xf32, #tpu.memory_space<vmem>>, vector<64x256xf32>
    tpu.vector_store %arg8[%c0_51, %c0_52], %91 {strides = array<i32>} : memref<64x256xf32, #tpu.memory_space<vmem>>, vector<64x256xf32>,
    return
  }
  func.func @transform_0(%arg0: i32) -> (i32, i32) {
    %c0_i32 = arith.constant 0 : i32
    %c0_i32_0 = arith.constant 0 : i32
    return %arg0, %c0_i32 : i32, i32
  }
  func.func @transform_1(%arg0: i32) -> (i32, i32) {
    %c0_i32 = arith.constant 0 : i32
    %c0_i32_0 = arith.constant 0 : i32
    %c0_i32_1 = arith.constant 0 : i32
    return %c0_i32, %c0_i32_0 : i32, i32
  }
  func.func @transform_2(%arg0: i32) -> (i32, i32) {
    %c0_i32 = arith.constant 0 : i32
    %c0_i32_0 = arith.constant 0 : i32
    %c0_i32_1 = arith.constant 0 : i32
    return %c0_i32, %c0_i32_0 : i32, i32
  }
  func.func @transform_3(%arg0: i32) -> (i32, i32, i32) {
    %c0_i32 = arith.constant 0 : i32
    %c0_i32_0 = arith.constant 0 : i32
    %c0_i32_1 = arith.constant 0 : i32
    %c0_i32_2 = arith.constant 0 : i32
    return %c0_i32, %c0_i32_0, %c0_i32_1 : i32, i32, i32
  }
  func.func @transform_4(%arg0: i32) -> (i32, i32) {
    %c0_i32 = arith.constant 0 : i32
    %c0_i32_0 = arith.constant 0 : i32
    %c0_i32_1 = arith.constant 0 : i32
    return %c0_i32, %c0_i32_0 : i32, i32
  }
  func.func @transform_5(%arg0: i32) -> (i32, i32, i32) {
    %c0_i32 = arith.constant 0 : i32
    %c0_i32_0 = arith.constant 0 : i32
    %c0_i32_1 = arith.constant 0 : i32
    %c0_i32_2 = arith.constant 0 : i32
    return %c0_i32, %c0_i32_0, %c0_i32_1 : i32, i32, i32
  }
  func.func @transform_6(%arg0: i32) -> (i32, i32) {
    %c0_i32 = arith.constant 0 : i32
    %c0_i32_0 = arith.constant 0 : i32
    %c0_i32_1 = arith.constant 0 : i32
    return %c0_i32, %c0_i32_0 : i32, i32
  }
  func.func @transform_7(%arg0: i32) -> (i32, i32) {
    %c0_i32 = arith.constant 0 : i32
    %c0_i32_0 = arith.constant 0 : i32
    return %arg0, %c0_i32 : i32, i32
  }
}

</mosaic_0001>

<bundles_post_ra>
// kernel: decoder_block.1
= control target key start
LH: loop header
LB: loop body
LE: loop exit
PB: predicated region body
PF: predicated region fallthrough
CT: control target
= control target key end

     0   :  { %s3440_s24 = smov 0   ;;  %s4784_s0 = inlined_call_operand.vmem [shape: f32[64,128], index: 0, kind: input, shape index: {}]   ;;  %s4785_s1 = inlined_call_operand.vmem [shape: bf16[64,32], index: 1, kind: input, shape index: {}]   ;;  %s4786_s2 = inlined_call_operand.vmem [shape: bf16[128,256], index: 2, kind: input, shape index: {}]   ;;  %s4787_s3 = inlined_call_operand.vmem [shape: bf16[3,256,256], index: 3, kind: input, shape index: {}]   ;;  %s4788_s4 = inlined_call_operand.vmem [shape: f32[1,256], index: 4, kind: input, shape index: {}]   ;;  %s4789_s5 = inlined_call_operand.vmem [shape: bf16[3,256,256], index: 5, kind: input, shape index: {}]   ;;  %s4790_s6 = inlined_call_operand.vmem [shape: f32[1,256], index: 6, kind: input, shape index: {}]   ;;  %s4791_s7 = inlined_call_operand.vmem [shape: f32[128,256], index: 7, kind: output, shape index: {}]  }
   0x1 LB: > { %s2709_s25 = sadd.s32 4294967295, %s3397_s24   ;;  %p2713_p0 = scmp.ge.s32.totalorder %s3397_s24, 1  ;;  %s3397_s24 = sphi %s3440_s24, %s17_s24  }
   0x2   : > { %p238_p1 = scmp.lt.s32.totalorder %s3397_s24, 3 }
   0x4   : > { %p239_p2 = pnand %p2713_p0, %p238_p1 }
   0x6   : > { %242 = sbr.rel (%p239_p2) target bundleno = 1100 (0x44c), region = 48 }
   0xd   : > { %v3075_v0 = vld [vmem:[%s4786_s2 + $0x4] ss:$8 sps:$4 sm:$0xff]   ;;  %v3077_v1 = vld [vmem:[%s4786_s2] ss:$8 sps:$4 sm:$0xff]   ;;  %v3399_v2 = vmov 0   ;;  %s2714_s17 = sshll.u32 %s2709_s25, 2 }
   0xe   : > { %419 = vmatprep.mubr.bf16.mxu0 %v3399_v2  ;;  %517 = vmatprep.mubr.bf16.mxu1 %v3399_v2  ;;  %v3078_v3 = vld [vmem:[%s4786_s2 + $0x14] ss:$8 sps:$4 sm:$0xff]   ;;  %v3080_v4 = vld [vmem:[%s4786_s2 + $0x10] ss:$8 sps:$4 sm:$0xff]   ;;  %v3081_v5 = vld [vmem:[%s4786_s2 + $0x24] ss:$8 sps:$4 sm:$0xff]  }
   0xf   : > { %387 = vmatprep.subr.bf16.mxu0 %v3075_v0  ;;  %v3083_v6 = vld [vmem:[%s4786_s2 + $0x20] ss:$8 sps:$4 sm:$0xff]   ;;  %v3084_v7 = vld [vmem:[%s4786_s2 + $0x34] ss:$8 sps:$4 sm:$0xff]   ;;  %v3086_v8 = vld [vmem:[%s4786_s2 + $0x30] ss:$8 sps:$4 sm:$0xff]  }
  0x10   : > { %388 = vmatpush1.bf16.msra.mxu0 %v3077_v1  ;;  %v3087_v9 = vld [vmem:[%s4786_s2 + $0x44] ss:$8 sps:$4 sm:$0xff]   ;;  %p272_p3 = scmp.lt.s32.totalorder %s2714_s17, 7  ;;  %v3089_v10 = vld [vmem:[%s4786_s2 + $0x40] ss:$8 sps:$4 sm:$0xff]   ;;  %vm472_vm0 = vcmask 261120  }
  0x11   : > { %389 = vmatprep.subr.bf16.mxu0 %v3078_v3  ;;  %v3090_v11 = vld [vmem:[%s4786_s2 + $0x54] ss:$8 sps:$4 sm:$0xff]   ;;  %v3092_v12 = vld [vmem:[%s4786_s2 + $0x50] ss:$8 sps:$4 sm:$0xff]   ;;  %v3093_v13 = vld [vmem:[%s4786_s2 + $0x64] ss:$8 sps:$4 sm:$0xff]  }
  0x12   : > { %s4831_s17 = smov (!%p272_p3, %s2714_s17), 7  ;;  %v3095_v14 = vld [vmem:[%s4786_s2 + $0x60] ss:$8 sps:$4 sm:$0xff]   ;;  %v3096_v15 = vld [vmem:[%s4786_s2 + $0x74] ss:$8 sps:$4 sm:$0xff]   ;;  %s2716_s14 = sshll.u32 %s2709_s25, 3 }
  0x13   : > { %s2715_s9 = sshll.u32 %s4831_s17, 3  ;;  %v3098_v16 = vld [vmem:[%s4786_s2 + $0x70] ss:$8 sps:$4 sm:$0xff]   ;;  %v3106_v23 = vld [vmem:[%s4787_s3 + $0x200] ss:$8 sps:$4 sm:$0xff]   ;;  %p278_p4 = scmp.lt.s32.totalorder %s2716_s14, 15 }
  0x14   : > { %390 = vmatpush1.bf16.msra.mxu0 %v3080_v4  ;;  %s275_s16 = scalar_lea.vmem %s4784_s0, %s2715_s9  ;;  %v3108_v24 = vld [vmem:[%s4787_s3 + $0x204] ss:$8 sps:$4 sm:$0xff]   ;;  %v3114_v25 = vld [vmem:[%s4787_s3 + $0x214] ss:$8 sps:$4 sm:$0xff]   ;;  %v3112_v26 = vld [vmem:[%s4787_s3 + $0x210] ss:$8 sps:$4 sm:$0xff]  }
  0x15   : > { %391 = vmatprep.subr.bf16.mxu0 %v3081_v5  ;;  %v285_v17 = vld [vmem:[%s275_s16] sm:$0xff]  ;;  %v286_v18 = vld [vmem:[%s275_s16 + $0x8] sm:$0xff]  ;;  %v287_v20 = vld [vmem:[%s275_s16 + $0x10] sm:$0xff]  ;;  %s4833_s14 = smov (!%p278_p4, %s2716_s14), 15 }
  0x16   : > { %v289_v19 = vpack.c.bf16 %v286_v18, %v285_v17  ;;  %v288_v21 = vld [vmem:[%s275_s16 + $0x18] sm:$0xff]  ;;  %v3120_v27 = vld [vmem:[%s4787_s3 + $0x224] ss:$8 sps:$4 sm:$0xff]   ;;  %v3118_v28 = vld [vmem:[%s4787_s3 + $0x220] ss:$8 sps:$4 sm:$0xff]   ;;  %s3065_s25 = sshll.u32 %s4833_s14, 4 }
  0x17   : > { %v290_v22 = vpack.c.bf16 %v288_v21, %v287_v20  ;;  %v3126_v29 = vld [vmem:[%s4787_s3 + $0x234] ss:$8 sps:$4 sm:$0xff]   ;;  %v3124_v30 = vld [vmem:[%s4787_s3 + $0x230] ss:$8 sps:$4 sm:$0xff]   ;;  %v3132_v31 = vld [vmem:[%s4787_s3 + $0x244] ss:$8 sps:$4 sm:$0xff]   ;;  %s4698_s17 = scalar_lea.vmem %s4791_s7, %s3065_s25 }
  0x18   : > { %392 = vmatpush1.bf16.msra.mxu0 %v3083_v6  ;;  %v3130_v32 = vld [vmem:[%s4787_s3 + $0x240] ss:$8 sps:$4 sm:$0xff]   ;;  %v3138_v33 = vld [vmem:[%s4787_s3 + $0x254] ss:$8 sps:$4 sm:$0xff]   ;;  %v3136_v34 = vld [vmem:[%s4787_s3 + $0x250] ss:$8 sps:$4 sm:$0xff]  }
  0x19   : > { %393 = vmatprep.subr.bf16.mxu0 %v3084_v7  ;;  %v3144_v35 = vld [vmem:[%s4787_s3 + $0x264] ss:$8 sps:$4 sm:$0xff]   ;;  %v3142_v36 = vld [vmem:[%s4787_s3 + $0x260] ss:$8 sps:$4 sm:$0xff]   ;;  %v3150_v37 = vld [vmem:[%s4787_s3 + $0x274] ss:$8 sps:$4 sm:$0xff]  }
  0x1a   : > { %v3148_v38 = vld [vmem:[%s4787_s3 + $0x270] ss:$8 sps:$4 sm:$0xff]   ;;  %v3156_v39 = vld [vmem:[%s4787_s3 + $0x284] ss:$8 sps:$4 sm:$0xff]   ;;  %v3154_v40 = vld [vmem:[%s4787_s3 + $0x280] ss:$8 sps:$4 sm:$0xff]  }
  0x1b   : > { %v3162_v41 = vld [vmem:[%s4787_s3 + $0x294] ss:$8 sps:$4 sm:$0xff]   ;;  %v3160_v42 = vld [vmem:[%s4787_s3 + $0x290] ss:$8 sps:$4 sm:$0xff]   ;;  %v3168_v43 = vld [vmem:[%s4787_s3 + $0x2a4] ss:$8 sps:$4 sm:$0xff]  }
  0x1c   : > { %394 = vmatpush1.bf16.msra.mxu0 %v3086_v8  ;;  %v3166_v44 = vld [vmem:[%s4787_s3 + $0x2a0] ss:$8 sps:$4 sm:$0xff]   ;;  %v3174_v45 = vld [vmem:[%s4787_s3 + $0x2b4] ss:$8 sps:$4 sm:$0xff]   ;;  %v3172_v46 = vld [vmem:[%s4787_s3 + $0x2b0] ss:$8 sps:$4 sm:$0xff]  }
  0x1d   : > { %395 = vmatprep.subr.bf16.mxu0 %v3087_v9  ;;  %v3180_v47 = vld [vmem:[%s4787_s3 + $0x2c4] ss:$8 sps:$4 sm:$0xff]   ;;  %v3178_v48 = vld [vmem:[%s4787_s3 + $0x2c0] ss:$8 sps:$4 sm:$0xff]   ;;  %v3186_v49 = vld [vmem:[%s4787_s3 + $0x2d4] ss:$8 sps:$4 sm:$0xff]  }
  0x1e   : > { %v3184_v50 = vld [vmem:[%s4787_s3 + $0x2d0] ss:$8 sps:$4 sm:$0xff]   ;;  %v3192_v51 = vld [vmem:[%s4787_s3 + $0x2e4] ss:$8 sps:$4 sm:$0xff]   ;;  %v3190_v52 = vld [vmem:[%s4787_s3 + $0x2e0] ss:$8 sps:$4 sm:$0xff]  }
  0x1f   : > { %v3105_v1 = vld [vmem:[%s4787_s3 + $0x4] ss:$8 sps:$4 sm:$0xff]   ;;  %v3103_v4 = vld [vmem:[%s4787_s3] ss:$8 sps:$4 sm:$0xff]   ;;  %v3111_v5 = vld [vmem:[%s4787_s3 + $0x14] ss:$8 sps:$4 sm:$0xff]  }
  0x20   : > { %396 = vmatpush1.bf16.msra.mxu0 %v3089_v10  ;;  %v3099_v3 = vld [vmem:[%s4785_s1] sm:$0xff]   ;;  %v3109_v6 = vld [vmem:[%s4787_s3 + $0x10] ss:$8 sps:$4 sm:$0xff]   ;;  %v3100_v8 = vld [vmem:[%s4785_s1 + $0x8] sm:$0xff]  }
  0x21   : > { %397 = vmatprep.subr.bf16.mxu0 %v3090_v11  ;;  %v3117_v7 = vld [vmem:[%s4787_s3 + $0x24] ss:$8 sps:$4 sm:$0xff]   ;;  %v3115_v9 = vld [vmem:[%s4787_s3 + $0x20] ss:$8 sps:$4 sm:$0xff]   ;;  %v3123_v10 = vld [vmem:[%s4787_s3 + $0x34] ss:$8 sps:$4 sm:$0xff]  }
  0x22   : > { %v3121_v11 = vld [vmem:[%s4787_s3 + $0x30] ss:$8 sps:$4 sm:$0xff]   ;;  %v3141_v17 = vld [vmem:[%s4787_s3 + $0x64] ss:$8 sps:$4 sm:$0xff]  }
  0x23   : > { %v3102_v18 = vld [vmem:[%s4785_s1 + $0x18] sm:$0xff]   ;;  %v3153_v21 = vld [vmem:[%s4787_s3 + $0x84] ss:$8 sps:$4 sm:$0xff]  }
  0x24   : > { %398 = vmatpush1.bf16.msra.mxu0 %v3092_v12  ;;  %v3129_v12 = vld [vmem:[%s4787_s3 + $0x44] ss:$8 sps:$4 sm:$0xff]   ;;  %v3145_v20 = vld [vmem:[%s4787_s3 + $0x70] ss:$8 sps:$4 sm:$0xff]  }
  0x25   : > { %399 = vmatprep.subr.bf16.mxu0 %v3093_v13  ;;  %v3101_v13 = vld [vmem:[%s4785_s1 + $0x10] sm:$0xff]  }
  0x28   : > { %400 = vmatpush1.bf16.msra.mxu0 %v3095_v14  ;;  %v3127_v14 = vld [vmem:[%s4787_s3 + $0x40] ss:$8 sps:$4 sm:$0xff]  }
  0x29   : > { %401 = vmatprep.subr.bf16.mxu0 %v3096_v15  ;;  %v3135_v15 = vld [vmem:[%s4787_s3 + $0x54] ss:$8 sps:$4 sm:$0xff]  }
  0x2c   : > { %402 = vmatpush1.bf16.msra.mxu0 %v3098_v16  ;;  %v3133_v16 = vld [vmem:[%s4787_s3 + $0x50] ss:$8 sps:$4 sm:$0xff]  }
  0x2d   : > { %1178 = vmatprep.subr.bf16.mxu0 %v3108_v24  ;;  %v3157_v24 = vld [vmem:[%s4787_s3 + $0x90] ss:$8 sps:$4 sm:$0xff]  }
  0x2f   : > { %420 = vmatmul.mubr.bf16.vlgmr.msra.gmra.mrb[0].mxu0 %v289_v19  ;;  %v3139_v19 = vld [vmem:[%s4787_s3 + $0x60] ss:$8 sps:$4 sm:$0xff]  }
  0x30   : > { %429 = vmatprep.mubr.bf16.mxu0 %v3399_v2  ;;  %1179 = vmatpush1.bf16.msra.mxu0 %v3106_v23  ;;  %v3159_v23 = vld [vmem:[%s4787_s3 + $0x94] ss:$8 sps:$4 sm:$0xff]  }
  0x31   : > { %1180 = vmatprep.subr.bf16.mxu0 %v3114_v25  ;;  %v3165_v25 = vld [vmem:[%s4787_s3 + $0xa4] ss:$8 sps:$4 sm:$0xff]  }
  0x34   : > { %1181 = vmatpush1.bf16.msra.mxu0 %v3112_v26  ;;  %v3163_v26 = vld [vmem:[%s4787_s3 + $0xa0] ss:$8 sps:$4 sm:$0xff]  }
  0x35   : > { %1182 = vmatprep.subr.bf16.mxu0 %v3120_v27  ;;  %v3171_v27 = vld [vmem:[%s4787_s3 + $0xb4] ss:$8 sps:$4 sm:$0xff]  }
  0x37   : > { %430 = vmatmul.mubr.bf16.gmra.mrb[4].mxu0 %v290_v22  ;;  %v3151_v22 = vld [vmem:[%s4787_s3 + $0x80] ss:$8 sps:$4 sm:$0xff]  }
  0x38   : > { %1183 = vmatpush1.bf16.msra.mxu0 %v3118_v28  ;;  %v3169_v28 = vld [vmem:[%s4787_s3 + $0xb0] ss:$8 sps:$4 sm:$0xff]  }
  0x39   : > { %1184 = vmatprep.subr.bf16.mxu0 %v3126_v29  ;;  %v3177_v29 = vld [vmem:[%s4787_s3 + $0xc4] ss:$8 sps:$4 sm:$0xff]  }
  0x3c   : > { %1185 = vmatpush1.bf16.msra.mxu0 %v3124_v30  ;;  %v3175_v30 = vld [vmem:[%s4787_s3 + $0xc0] ss:$8 sps:$4 sm:$0xff]  }
  0x3d   : > { %1186 = vmatprep.subr.bf16.mxu0 %v3132_v31  ;;  %v3183_v31 = vld [vmem:[%s4787_s3 + $0xd4] ss:$8 sps:$4 sm:$0xff]  }
  0x40   : > { %1187 = vmatpush1.bf16.msra.mxu0 %v3130_v32  ;;  %v3181_v32 = vld [vmem:[%s4787_s3 + $0xd0] ss:$8 sps:$4 sm:$0xff]  }
  0x41   : > { %1188 = vmatprep.subr.bf16.mxu0 %v3138_v33  ;;  %v3189_v33 = vld [vmem:[%s4787_s3 + $0xe4] ss:$8 sps:$4 sm:$0xff]  }
  0x44   : > { %1189 = vmatpush1.bf16.msra.mxu0 %v3136_v34  ;;  %v3187_v34 = vld [vmem:[%s4787_s3 + $0xe0] ss:$8 sps:$4 sm:$0xff]  }
  0x45   : > { %1190 = vmatprep.subr.bf16.mxu0 %v3144_v35  ;;  %v3195_v35 = vld [vmem:[%s4787_s3 + $0xf4] ss:$8 sps:$4 sm:$0xff]  }
  0x48   : > { %1191 = vmatpush1.bf16.msra.mxu0 %v3142_v36  ;;  %v3193_v36 = vld [vmem:[%s4787_s3 + $0xf0] ss:$8 sps:$4 sm:$0xff]  }
  0x49   : > { %1192 = vmatprep.subr.bf16.mxu0 %v3150_v37  ;;  %v3198_v37 = vld [vmem:[%s4787_s3 + $0x2f4] ss:$8 sps:$4 sm:$0xff]  }
  0x4c   : > { %1193 = vmatpush1.bf16.msra.mxu0 %v3148_v38  ;;  %v3196_v38 = vld [vmem:[%s4787_s3 + $0x2f0] ss:$8 sps:$4 sm:$0xff]  }
  0x4d   : > { %1194 = vmatprep.subr.bf16.mxu0 %v3156_v39  ;;  %v3201_v39 = vld [vmem:[%s4787_s3 + $0x104] ss:$8 sps:$4 sm:$0xff]  }
  0x50   : > { %1195 = vmatpush1.bf16.msra.mxu0 %v3154_v40 }
  0x51   : > { %1196 = vmatprep.subr.bf16.mxu0 %v3162_v41 }
  0x54   : > { %1197 = vmatpush1.bf16.msra.mxu0 %v3160_v42 }
  0x55   : > { %1198 = vmatprep.subr.bf16.mxu0 %v3168_v43 }
  0x58   : > { %1199 = vmatpush1.bf16.msra.mxu0 %v3166_v44 }
  0x59   : > { %1200 = vmatprep.subr.bf16.mxu0 %v3174_v45 }
  0x5c   : > { %1201 = vmatpush1.bf16.msra.mxu0 %v3172_v46  ;;  %v3199_v46 = vld [vmem:[%s4787_s3 + $0x100] ss:$8 sps:$4 sm:$0xff]  }
  0x5d   : > { %1202 = vmatprep.subr.bf16.mxu0 %v3180_v47  ;;  %v3204_v47 = vld [vmem:[%s4787_s3 + $0x114] ss:$8 sps:$4 sm:$0xff]  }
  0x60   : > { %1203 = vmatpush1.bf16.msra.mxu0 %v3178_v48 }
  0x61   : > { %1204 = vmatprep.subr.bf16.mxu0 %v3186_v49  ;;  %v3202_v49 = vld [vmem:[%s4787_s3 + $0x110] ss:$8 sps:$4 sm:$0xff]  }
  0x64   : > { %1205 = vmatpush1.bf16.msra.mxu0 %v3184_v50 }
  0x65   : > { %1206 = vmatprep.subr.bf16.mxu0 %v3192_v51  ;;  %v3207_v51 = vld [vmem:[%s4787_s3 + $0x124] ss:$8 sps:$4 sm:$0xff]  }
  0x68   : > { %1207 = vmatpush1.bf16.msra.mxu0 %v3190_v52 }
  0x69   : > { %1208 = vmatprep.subr.bf16.mxu0 %v3198_v37  ;;  %v3256_v37 = vld [vmem:[%s4789_s5 + $0x210] ss:$8 sps:$4 sm:$0xff]  }
  0x6c   : > { %1209 = vmatpush1.bf16.msra.mxu0 %v3196_v38  ;;  %v3258_v38 = vld [vmem:[%s4789_s5 + $0x214] ss:$8 sps:$4 sm:$0xff]  }
 0x102   : > { %v421_v53 = vpop.f32.mrb[0].mxu0 }
 0x103   : > { %v423_v54 = vpop.f32.mrb[1].mxu0 }
 0x104   : > { %v425_v55 = vpop.f32.mrb[2].mxu0 }
 0x105   : > { %v448_v56 = vpack.c.bf16 %v425_v55, %v421_v53  ;;  %v427_v57 = vpop.f32.mrb[3].mxu0 }
 0x106   : > { %v449_v58 = vpack.c.bf16 %v427_v57, %v423_v54  ;;  %v3210_v57 = vld [vmem:[%s4787_s3 + $0x134] ss:$8 sps:$4 sm:$0xff]  }
 0x108   : > { %485 = vmatprep.subr.bf16.mxu1 %v449_v58 }
 0x109   : > { %486 = vmatpush1.bf16.msra.mxu1 %v448_v56  ;;  %v3205_v56 = vld [vmem:[%s4787_s3 + $0x120] ss:$8 sps:$4 sm:$0xff]  }
 0x10a   : > { %v431_v59 = vpop.f32.mrb[4].mxu0 }
 0x10b   : > { %v433_v60 = vpop.f32.mrb[5].mxu0 }
 0x10c   : > { %v435_v61 = vpop.f32.mrb[6].mxu0 }
 0x10d   : > { %v450_v62 = vpack.c.bf16 %v435_v61, %v431_v59  ;;  %v437_v63 = vpop.f32.mrb[7].mxu0  ;;  %v3208_v59 = vld [vmem:[%s4787_s3 + $0x130] ss:$8 sps:$4 sm:$0xff]   ;;  %v3213_v61 = vld [vmem:[%s4787_s3 + $0x144] ss:$8 sps:$4 sm:$0xff]  }
 0x10e   : > { %v451_v0 = vpack.c.bf16 %v437_v63, %v433_v60 }
 0x110   : > { %487 = vmatprep.subr.bf16.mxu1 %v451_v0 }
 0x111   : > { %488 = vmatpush1.bf16.msra.mxu1 %v450_v62 }
 0x112   : > { %879 = vmatprep.subr.bf16.mxu1 %v3105_v1 }
 0x114   : > { %2739 = vmatmul.mubr.msk.bf16.vlgmr.msra.gmra.mrb[0].mxu1 %vm472_vm0, %v3099_v3  ;;  %v3211_v3 = vld [vmem:[%s4787_s3 + $0x140] ss:$8 sps:$4 sm:$0xff]  }
 0x115   : > { %527 = vmatprep.mubr.bf16.mxu1 %v3399_v2  ;;  %880 = vmatpush1.bf16.msra.mxu1 %v3103_v4  ;;  %v3216_v4 = vld [vmem:[%s4787_s3 + $0x154] ss:$8 sps:$4 sm:$0xff]  }
 0x116   : > { %881 = vmatprep.subr.bf16.mxu1 %v3111_v5 }
 0x119   : > { %882 = vmatpush1.bf16.msra.mxu1 %v3109_v6  ;;  %v3214_v6 = vld [vmem:[%s4787_s3 + $0x150] ss:$8 sps:$4 sm:$0xff]  }
 0x11a   : > { %883 = vmatprep.subr.bf16.mxu1 %v3117_v7 }
 0x11c   : > { %2740 = vmatmul.mubr.msk.bf16.gmra.mrb[4].mxu1 %vm472_vm0, %v3100_v8  ;;  %v3219_v8 = vld [vmem:[%s4787_s3 + $0x164] ss:$8 sps:$4 sm:$0xff]  }
 0x11d   : > { %537 = vmatprep.mubr.bf16.mxu1 %v3399_v2  ;;  %884 = vmatpush1.bf16.msra.mxu1 %v3115_v9 }
 0x11e   : > { %885 = vmatprep.subr.bf16.mxu1 %v3123_v10 }
 0x121   : > { %886 = vmatpush1.bf16.msra.mxu1 %v3121_v11 }
 0x122   : > { %887 = vmatprep.subr.bf16.mxu1 %v3129_v12 }
 0x124   : > { %2741 = vmatmul.mubr.msk.bf16.gmra.mrb[8].mxu1 %vm472_vm0, %v3101_v13  ;;  %v3217_v13 = vld [vmem:[%s4787_s3 + $0x160] ss:$8 sps:$4 sm:$0xff]  }
 0x125   : > { %547 = vmatprep.mubr.bf16.mxu1 %v3399_v2  ;;  %888 = vmatpush1.bf16.msra.mxu1 %v3127_v14  ;;  %v3147_v2 = vld [vmem:[%s4787_s3 + $0x74] ss:$8 sps:$4 sm:$0xff]  }
 0x126   : > { %889 = vmatprep.subr.bf16.mxu1 %v3135_v15  ;;  %v3222_v14 = vld [vmem:[%s4787_s3 + $0x174] ss:$8 sps:$4 sm:$0xff]   ;;  %v3220_v15 = vld [vmem:[%s4787_s3 + $0x170] ss:$8 sps:$4 sm:$0xff]  }
 0x129   : > { %890 = vmatpush1.bf16.msra.mxu1 %v3133_v16  ;;  %v3225_v16 = vld [vmem:[%s4787_s3 + $0x184] ss:$8 sps:$4 sm:$0xff]  }
 0x12a   : > { %891 = vmatprep.subr.bf16.mxu1 %v3141_v17  ;;  %v3223_v17 = vld [vmem:[%s4787_s3 + $0x180] ss:$8 sps:$4 sm:$0xff]  }
 0x12c   : > { %2742 = vmatmul.mubr.msk.bf16.gmra.mrb[12].mxu1 %vm472_vm0, %v3102_v18  ;;  %v3228_v18 = vld [vmem:[%s4787_s3 + $0x194] ss:$8 sps:$4 sm:$0xff]  }
 0x12d   : > { %892 = vmatpush1.bf16.msra.mxu1 %v3139_v19  ;;  %v3226_v19 = vld [vmem:[%s4787_s3 + $0x190] ss:$8 sps:$4 sm:$0xff]  }
 0x12e   : > { %893 = vmatprep.subr.bf16.mxu1 %v3147_v2  ;;  %v3231_v2 = vld [vmem:[%s4787_s3 + $0x1a4] ss:$8 sps:$4 sm:$0xff]  }
 0x131   : > { %894 = vmatpush1.bf16.msra.mxu1 %v3145_v20  ;;  %v3229_v20 = vld [vmem:[%s4787_s3 + $0x1a0] ss:$8 sps:$4 sm:$0xff]  }
 0x132   : > { %895 = vmatprep.subr.bf16.mxu1 %v3153_v21  ;;  %v3234_v21 = vld [vmem:[%s4787_s3 + $0x1b4] ss:$8 sps:$4 sm:$0xff]  }
 0x135   : > { %896 = vmatpush1.bf16.msra.mxu1 %v3151_v22  ;;  %v3232_v22 = vld [vmem:[%s4787_s3 + $0x1b0] ss:$8 sps:$4 sm:$0xff]  }
 0x136   : > { %897 = vmatprep.subr.bf16.mxu1 %v3159_v23  ;;  %v3237_v23 = vld [vmem:[%s4787_s3 + $0x1c4] ss:$8 sps:$4 sm:$0xff]  }
 0x139   : > { %898 = vmatpush1.bf16.msra.mxu1 %v3157_v24  ;;  %v3235_v24 = vld [vmem:[%s4787_s3 + $0x1c0] ss:$8 sps:$4 sm:$0xff]  }
 0x13a   : > { %899 = vmatprep.subr.bf16.mxu1 %v3165_v25  ;;  %v3240_v25 = vld [vmem:[%s4787_s3 + $0x1d4] ss:$8 sps:$4 sm:$0xff]  }
 0x13d   : > { %900 = vmatpush1.bf16.msra.mxu1 %v3163_v26  ;;  %v3238_v26 = vld [vmem:[%s4787_s3 + $0x1d0] ss:$8 sps:$4 sm:$0xff]  }
 0x13e   : > { %901 = vmatprep.subr.bf16.mxu1 %v3171_v27  ;;  %v3243_v27 = vld [vmem:[%s4787_s3 + $0x1e4] ss:$8 sps:$4 sm:$0xff]  }
 0x141   : > { %902 = vmatpush1.bf16.msra.mxu1 %v3169_v28  ;;  %v3241_v28 = vld [vmem:[%s4787_s3 + $0x1e0] ss:$8 sps:$4 sm:$0xff]  }
 0x142   : > { %903 = vmatprep.subr.bf16.mxu1 %v3177_v29  ;;  %v3246_v29 = vld [vmem:[%s4787_s3 + $0x1f4] ss:$8 sps:$4 sm:$0xff]  }
 0x145   : > { %904 = vmatpush1.bf16.msra.mxu1 %v3175_v30  ;;  %v3244_v30 = vld [vmem:[%s4787_s3 + $0x1f0] ss:$8 sps:$4 sm:$0xff]  }
 0x146   : > { %905 = vmatprep.subr.bf16.mxu1 %v3183_v31  ;;  %v3247_v31 = vld [vmem:[%s4789_s5] ss:$8 sps:$4 sm:$0xff]  }
 0x149   : > { %906 = vmatpush1.bf16.msra.mxu1 %v3181_v32  ;;  %v3249_v32 = vld [vmem:[%s4789_s5 + $0x4] ss:$8 sps:$4 sm:$0xff]  }
 0x14a   : > { %907 = vmatprep.subr.bf16.mxu1 %v3189_v33  ;;  %v3250_v33 = vld [vmem:[%s4789_s5 + $0x200] ss:$8 sps:$4 sm:$0xff]   ;;  %1858 = vmatprep.subr.bf16.mxu0 %v3249_v32 }
 0x14b   : > { %v3319_v32 = vld [vmem:[%s4789_s5 + $0xc0] ss:$8 sps:$4 sm:$0xff]  }
 0x14d   : > { %908 = vmatpush1.bf16.msra.mxu1 %v3187_v34  ;;  %v3252_v34 = vld [vmem:[%s4789_s5 + $0x204] ss:$8 sps:$4 sm:$0xff]  }
 0x14e   : > { %909 = vmatprep.subr.bf16.mxu1 %v3195_v35  ;;  %v3255_v35 = vld [vmem:[%s4789_s5 + $0x14] ss:$8 sps:$4 sm:$0xff]  }
 0x151   : > { %910 = vmatpush1.bf16.msra.mxu1 %v3193_v36  ;;  %v3253_v36 = vld [vmem:[%s4789_s5 + $0x10] ss:$8 sps:$4 sm:$0xff]  }
 0x152   : > { %1509 = vmatprep.subr.bf16.mxu1 %v3201_v39  ;;  %v3259_v39 = vld [vmem:[%s4789_s5 + $0x20] ss:$8 sps:$4 sm:$0xff]  }
 0x1e7   : > { %v3718_v40 = vpop.f32.mrb[0].mxu1 }
 0x1e8   : > { %v3720_v41 = vpop.f32.mrb[1].mxu1 }
 0x1e9   : > { %v3722_v42 = vpop.f32.mrb[2].mxu1 }
 0x1ea   : > { %v3726_v43 = vpack.c.bf16 %v3722_v42, %v3718_v40  ;;  %v3728_v44 = vpop.f32.mrb[3].mxu1 }
 0x1eb   : > { %v680_v45 = vpack.c.bf16 %v3728_v44, %v3720_v41 }
 0x1ed   : > { %911 = vmatprep.mubr.bf16.mxu1 %v680_v45  ;;  %1210 = vmatprep.mubr.bf16.mxu0 %v680_v45 }
 0x1ee   : > { %912 = vmatmul.mubr.bf16.vlgmr.msra.gmra.mrb[16].mxu1 %v3726_v43  ;;  %1211 = vmatmul.mubr.bf16.vlgmr.msra.gmra.mrb[8].mxu0 %v3726_v43 }
 0x1ef   : > { %1510 = vmatpush1.bf16.msra.mxu1 %v3199_v46  ;;  %v3740_v48 = vpop.f32.mrb[4].mxu1  ;;  %1859 = vmatpush1.bf16.msra.mxu0 %v3247_v31  ;;  %v3262_v46 = vld [vmem:[%s4789_s5 + $0x220] ss:$8 sps:$4 sm:$0xff]   ;;  %v3321_v31 = vld [vmem:[%s4789_s5 + $0xc4] ss:$8 sps:$4 sm:$0xff]  }
 0x1f0   : > { %v3745_v50 = vpop.f32.mrb[5].mxu1  ;;  %1511 = vmatprep.subr.bf16.mxu1 %v3204_v47  ;;  %1860 = vmatprep.subr.bf16.mxu0 %v3255_v35  ;;  %v3267_v47 = vld [vmem:[%s4789_s5 + $0x34] ss:$8 sps:$4 sm:$0xff]  }
 0x1f1   : > { %v3750_v52 = vpop.f32.mrb[6].mxu1  ;;  %v3327_v35 = vld [vmem:[%s4789_s5 + $0xd4] ss:$8 sps:$4 sm:$0xff]  }
 0x1f2   : > { %v3754_v53 = vpack.c.bf16 %v3750_v52, %v3740_v48  ;;  %v3756_v54 = vpop.f32.mrb[7].mxu1 }
 0x1f3   : > { %v3760_v55 = vpack.c.bf16 %v3756_v54, %v3745_v50  ;;  %1512 = vmatpush1.bf16.msra.mxu1 %v3202_v49  ;;  %1861 = vmatpush1.bf16.msra.mxu0 %v3253_v36  ;;  %v3265_v49 = vld [vmem:[%s4789_s5 + $0x30] ss:$8 sps:$4 sm:$0xff]  }
 0x1f4   : > { %1513 = vmatprep.subr.bf16.mxu1 %v3207_v51  ;;  %v3270_v51 = vld [vmem:[%s4789_s5 + $0x234] ss:$8 sps:$4 sm:$0xff]   ;;  %v3325_v36 = vld [vmem:[%s4789_s5 + $0xd0] ss:$8 sps:$4 sm:$0xff]  }
 0x1f5   : > { %921 = vmatprep.mubr.bf16.mxu1 %v3760_v55  ;;  %1220 = vmatprep.mubr.bf16.mxu0 %v3760_v55 }
 0x1f6   : > { %922 = vmatmul.mubr.bf16.gmra.mrb[20].mxu1 %v3754_v53  ;;  %1221 = vmatmul.mubr.bf16.gmra.mrb[12].mxu0 %v3754_v53 }
 0x1f7   : > { %1514 = vmatpush1.bf16.msra.mxu1 %v3205_v56  ;;  %v3772_v58 = vpop.f32.mrb[8].mxu1  ;;  %v3271_v56 = vld [vmem:[%s4789_s5 + $0x40] ss:$8 sps:$4 sm:$0xff]  }
 0x1f8   : > { %v3777_v60 = vpop.f32.mrb[9].mxu1  ;;  %1515 = vmatprep.subr.bf16.mxu1 %v3210_v57  ;;  %v3276_v57 = vld [vmem:[%s4789_s5 + $0x244] ss:$8 sps:$4 sm:$0xff]  }
 0x1f9   : > { %v3782_v62 = vpop.f32.mrb[10].mxu1 }
 0x1fa   : > { %v3786_v63 = vpack.c.bf16 %v3782_v62, %v3772_v58  ;;  %v3788_v0 = vpop.f32.mrb[11].mxu1 }
 0x1fb   : > { %v3792_v1 = vpack.c.bf16 %v3788_v0, %v3777_v60  ;;  %1516 = vmatpush1.bf16.msra.mxu1 %v3208_v59  ;;  %v3274_v59 = vld [vmem:[%s4789_s5 + $0x240] ss:$8 sps:$4 sm:$0xff]  }
 0x1fc   : > { %1517 = vmatprep.subr.bf16.mxu1 %v3213_v61  ;;  %v3279_v61 = vld [vmem:[%s4789_s5 + $0x54] ss:$8 sps:$4 sm:$0xff]  }
 0x1fd   : > { %931 = vmatprep.mubr.bf16.mxu1 %v3792_v1  ;;  %1230 = vmatprep.mubr.bf16.mxu0 %v3792_v1 }
 0x1fe   : > { %932 = vmatmul.mubr.bf16.gmra.mrb[24].mxu1 %v3786_v63  ;;  %1231 = vmatmul.mubr.bf16.gmra.mrb[16].mxu0 %v3786_v63 }
 0x1ff   : > { %1518 = vmatpush1.bf16.msra.mxu1 %v3211_v3  ;;  %v3804_v5 = vpop.f32.mrb[12].mxu1  ;;  %v3280_v3 = vld [vmem:[%s4789_s5 + $0x250] ss:$8 sps:$4 sm:$0xff]  }
 0x200   : > { %v3809_v7 = vpop.f32.mrb[13].mxu1  ;;  %1519 = vmatprep.subr.bf16.mxu1 %v3216_v4  ;;  %v3285_v4 = vld [vmem:[%s4789_s5 + $0x64] ss:$8 sps:$4 sm:$0xff]  }
 0x201   : > { %v3814_v9 = vpop.f32.mrb[14].mxu1 }
 0x202   : > { %v685_v10 = vpack.c.bf16 %v3814_v9, %v3804_v5  ;;  %v3818_v11 = vpop.f32.mrb[15].mxu1 }
 0x203   : > { %4805 = vst [vmem:[#allocation2_spill] sm:$0xff] %v3818_v11  ;;  %v686_v12 = vpack.c.bf16 %v3818_v11, %v3809_v7  ;;  %1520 = vmatpush1.bf16.msra.mxu1 %v3214_v6  ;;  %v3288_v6 = vld [vmem:[%s4789_s5 + $0x264] ss:$8 sps:$4 sm:$0xff]  }
 0x204   : > { %1521 = vmatprep.subr.bf16.mxu1 %v3219_v8  ;;  %v3283_v8 = vld [vmem:[%s4789_s5 + $0x60] ss:$8 sps:$4 sm:$0xff]  }
 0x205   : > { %941 = vmatprep.mubr.bf16.mxu1 %v686_v12  ;;  %1240 = vmatprep.mubr.bf16.mxu0 %v686_v12 }
 0x206   : > { %942 = vmatmul.mubr.bf16.gmra.mrb[28].mxu1 %v685_v10  ;;  %1241 = vmatmul.mubr.bf16.gmra.mrb[20].mxu0 %v685_v10 }
 0x207   : > { %1522 = vmatpush1.bf16.msra.mxu1 %v3217_v13  ;;  %1541 = vmatprep.mubr.bf16.mxu1 %v680_v45  ;;  %v3264_v45 = vld [vmem:[%s4789_s5 + $0x224] ss:$8 sps:$4 sm:$0xff]   ;;  %v3294_v13 = vld [vmem:[%s4789_s5 + $0x274] ss:$8 sps:$4 sm:$0xff]  }
 0x208   : > { %1523 = vmatprep.subr.bf16.mxu1 %v3222_v14  ;;  %v3289_v14 = vld [vmem:[%s4789_s5 + $0x70] ss:$8 sps:$4 sm:$0xff]  }
 0x20b   : > { %1524 = vmatpush1.bf16.msra.mxu1 %v3220_v15  ;;  %v3292_v15 = vld [vmem:[%s4789_s5 + $0x270] ss:$8 sps:$4 sm:$0xff]  }
 0x20c   : > { %1525 = vmatprep.subr.bf16.mxu1 %v3225_v16  ;;  %v3297_v16 = vld [vmem:[%s4789_s5 + $0x84] ss:$8 sps:$4 sm:$0xff]  }
 0x20f   : > { %1526 = vmatpush1.bf16.msra.mxu1 %v3223_v17  ;;  %v3300_v17 = vld [vmem:[%s4789_s5 + $0x284] ss:$8 sps:$4 sm:$0xff]  }
 0x210   : > { %1527 = vmatprep.subr.bf16.mxu1 %v3228_v18  ;;  %v3295_v18 = vld [vmem:[%s4789_s5 + $0x80] ss:$8 sps:$4 sm:$0xff]  }
 0x213   : > { %1528 = vmatpush1.bf16.msra.mxu1 %v3226_v19  ;;  %v3298_v19 = vld [vmem:[%s4789_s5 + $0x280] ss:$8 sps:$4 sm:$0xff]  }
 0x214   : > { %1529 = vmatprep.subr.bf16.mxu1 %v3231_v2  ;;  %v3303_v2 = vld [vmem:[%s4789_s5 + $0x94] ss:$8 sps:$4 sm:$0xff]  }
 0x217   : > { %1530 = vmatpush1.bf16.msra.mxu1 %v3229_v20  ;;  %v3306_v20 = vld [vmem:[%s4789_s5 + $0x294] ss:$8 sps:$4 sm:$0xff]  }
 0x218   : > { %1531 = vmatprep.subr.bf16.mxu1 %v3234_v21  ;;  %v3301_v21 = vld [vmem:[%s4789_s5 + $0x90] ss:$8 sps:$4 sm:$0xff]  }
 0x21b   : > { %1532 = vmatpush1.bf16.msra.mxu1 %v3232_v22  ;;  %v3304_v22 = vld [vmem:[%s4789_s5 + $0x290] ss:$8 sps:$4 sm:$0xff]  }
 0x21c   : > { %1533 = vmatprep.subr.bf16.mxu1 %v3237_v23  ;;  %v3309_v23 = vld [vmem:[%s4789_s5 + $0xa4] ss:$8 sps:$4 sm:$0xff]  }
 0x21f   : > { %1534 = vmatpush1.bf16.msra.mxu1 %v3235_v24  ;;  %v3312_v24 = vld [vmem:[%s4789_s5 + $0x2a4] ss:$8 sps:$4 sm:$0xff]  }
 0x220   : > { %1535 = vmatprep.subr.bf16.mxu1 %v3240_v25  ;;  %v3307_v25 = vld [vmem:[%s4789_s5 + $0xa0] ss:$8 sps:$4 sm:$0xff]  }
 0x223   : > { %1536 = vmatpush1.bf16.msra.mxu1 %v3238_v26  ;;  %v3310_v26 = vld [vmem:[%s4789_s5 + $0x2a0] ss:$8 sps:$4 sm:$0xff]  }
 0x224   : > { %1537 = vmatprep.subr.bf16.mxu1 %v3243_v27  ;;  %v3315_v27 = vld [vmem:[%s4789_s5 + $0xb4] ss:$8 sps:$4 sm:$0xff]  }
 0x227   : > { %1538 = vmatpush1.bf16.msra.mxu1 %v3241_v28  ;;  %v3318_v28 = vld [vmem:[%s4789_s5 + $0x2b4] ss:$8 sps:$4 sm:$0xff]  }
 0x228   : > { %1539 = vmatprep.subr.bf16.mxu1 %v3246_v29  ;;  %v3313_v29 = vld [vmem:[%s4789_s5 + $0xb0] ss:$8 sps:$4 sm:$0xff]  }
 0x22b   : > { %1540 = vmatpush1.bf16.msra.mxu1 %v3244_v30  ;;  %v3316_v30 = vld [vmem:[%s4789_s5 + $0x2b0] ss:$8 sps:$4 sm:$0xff]  }
 0x22c   : > { %2157 = vmatprep.subr.bf16.mxu1 %v3252_v34  ;;  %v3322_v34 = vld [vmem:[%s4789_s5 + $0x2c0] ss:$8 sps:$4 sm:$0xff]  }
 0x22e   : > { %1542 = vmatmul.mubr.bf16.vlgmr.msra.gmra.mrb[32].mxu1 %v3726_v43  ;;  %v3261_v43 = vld [vmem:[%s4789_s5 + $0x24] ss:$8 sps:$4 sm:$0xff]  }
 0x22f   : > { %1551 = vmatprep.mubr.bf16.mxu1 %v3760_v55  ;;  %2158 = vmatpush1.bf16.msra.mxu1 %v3250_v33  ;;  %v3273_v55 = vld [vmem:[%s4789_s5 + $0x44] ss:$8 sps:$4 sm:$0xff]  }
 0x230   : > { %2159 = vmatprep.subr.bf16.mxu1 %v3258_v38  ;;  %1862 = vmatprep.subr.bf16.mxu0 %v3261_v43  ;;  %v3324_v33 = vld [vmem:[%s4789_s5 + $0x2c4] ss:$8 sps:$4 sm:$0xff]   ;;  %v3328_v38 = vld [vmem:[%s4789_s5 + $0x2d0] ss:$8 sps:$4 sm:$0xff]   ;;  %v3331_v43 = vld [vmem:[%s4789_s5 + $0xe0] ss:$8 sps:$4 sm:$0xff]  }
 0x231   : > { %1863 = vmatpush1.bf16.msra.mxu0 %v3259_v39  ;;  %v3333_v39 = vld [vmem:[%s4789_s5 + $0xe4] ss:$8 sps:$4 sm:$0xff]  }
 0x232   : > { %1864 = vmatprep.subr.bf16.mxu0 %v3267_v47  ;;  %v3339_v47 = vld [vmem:[%s4789_s5 + $0xf4] ss:$8 sps:$4 sm:$0xff]  }
 0x233   : > { %2160 = vmatpush1.bf16.msra.mxu1 %v3256_v37  ;;  %v3330_v37 = vld [vmem:[%s4789_s5 + $0x2d4] ss:$8 sps:$4 sm:$0xff]  }
 0x234   : > { %2161 = vmatprep.subr.bf16.mxu1 %v3264_v45  ;;  %v3336_v45 = vld [vmem:[%s4789_s5 + $0x2e4] ss:$8 sps:$4 sm:$0xff]  }
 0x235   : > { %1865 = vmatpush1.bf16.msra.mxu0 %v3265_v49  ;;  %v3337_v49 = vld [vmem:[%s4789_s5 + $0xf0] ss:$8 sps:$4 sm:$0xff]  }
 0x236   : > { %1552 = vmatmul.mubr.bf16.gmra.mrb[36].mxu1 %v3754_v53  ;;  %v3268_v53 = vld [vmem:[%s4789_s5 + $0x230] ss:$8 sps:$4 sm:$0xff]   ;;  %1866 = vmatprep.subr.bf16.mxu0 %v3273_v55  ;;  %v3345_v55 = vld [vmem:[%s4789_s5 + $0x104] ss:$8 sps:$4 sm:$0xff]  }
 0x237   : > { %1561 = vmatprep.mubr.bf16.mxu1 %v3792_v1  ;;  %2162 = vmatpush1.bf16.msra.mxu1 %v3262_v46  ;;  %v3277_v1 = vld [vmem:[%s4789_s5 + $0x50] ss:$8 sps:$4 sm:$0xff]   ;;  %v3334_v46 = vld [vmem:[%s4789_s5 + $0x2e0] ss:$8 sps:$4 sm:$0xff]  }
 0x238   : > { %2163 = vmatprep.subr.bf16.mxu1 %v3270_v51  ;;  %v3342_v51 = vld [vmem:[%s4789_s5 + $0x2f4] ss:$8 sps:$4 sm:$0xff]  }
 0x239   : > { %1867 = vmatpush1.bf16.msra.mxu0 %v3271_v56  ;;  %v558_v56 = vlaneseq }
 0x23a   : > { %1868 = vmatprep.subr.bf16.mxu0 %v3279_v61 }
 0x23b   : > { %2164 = vmatpush1.bf16.msra.mxu1 %v3268_v53  ;;  %v3340_v53 = vld [vmem:[%s4789_s5 + $0x2f0] ss:$8 sps:$4 sm:$0xff]  }
 0x23c   : > { %2165 = vmatprep.subr.bf16.mxu1 %v3276_v57  ;;  %v4079_v57 = vshrl.u32 %v558_v56, 7 }
 0x23d   : > { %1869 = vmatpush1.bf16.msra.mxu0 %v3277_v1 }
 0x23e   : > { %1562 = vmatmul.mubr.bf16.gmra.mrb[40].mxu1 %v3786_v63  ;;  %v3282_v63 = vld [vmem:[%s4789_s5 + $0x254] ss:$8 sps:$4 sm:$0xff]   ;;  %1870 = vmatprep.subr.bf16.mxu0 %v3285_v4  ;;  %vm1267_vm1 = vcmp.lt.s32.totalorder %v4079_v57, 1  ;;  %vm1316_vm2 = vcmp.lt.s32.totalorder %v4079_v57, 7 }
 0x23f   : > { %1571 = vmatprep.mubr.bf16.mxu1 %v686_v12  ;;  %2166 = vmatpush1.bf16.msra.mxu1 %v3274_v59  ;;  %v3291_v12 = vld [vmem:[%s4789_s5 + $0x74] ss:$8 sps:$4 sm:$0xff]  }
 0x240   : > { %2167 = vmatprep.subr.bf16.mxu1 %v3282_v63 }
 0x241   : > { %1871 = vmatpush1.bf16.msra.mxu0 %v3283_v8 }
 0x242   : > { %1872 = vmatprep.subr.bf16.mxu0 %v3291_v12 }
 0x243   : > { %2168 = vmatpush1.bf16.msra.mxu1 %v3280_v3 }
 0x244   : > { %2169 = vmatprep.subr.bf16.mxu1 %v3288_v6 }
 0x245   : > { %1873 = vmatpush1.bf16.msra.mxu0 %v3289_v14 }
 0x246   : > { %1572 = vmatmul.mubr.bf16.gmra.mrb[44].mxu1 %v685_v10  ;;  %v3286_v10 = vld [vmem:[%s4789_s5 + $0x260] ss:$8 sps:$4 sm:$0xff]   ;;  %1874 = vmatprep.subr.bf16.mxu0 %v3297_v16 }
 0x247   : > { %2170 = vmatpush1.bf16.msra.mxu1 %v3286_v10 }
 0x248   : > { %2171 = vmatprep.subr.bf16.mxu1 %v3294_v13 }
 0x249   : > { %1875 = vmatpush1.bf16.msra.mxu0 %v3295_v18 }
 0x24a   : > { %1876 = vmatprep.subr.bf16.mxu0 %v3303_v2 }
 0x24b   : > { %2172 = vmatpush1.bf16.msra.mxu1 %v3292_v15 }
 0x24c   : > { %2173 = vmatprep.subr.bf16.mxu1 %v3300_v17 }
 0x24d   : > { %1877 = vmatpush1.bf16.msra.mxu0 %v3301_v21 }
 0x24e   : > { %1878 = vmatprep.subr.bf16.mxu0 %v3309_v23 }
 0x24f   : > { %2174 = vmatpush1.bf16.msra.mxu1 %v3298_v19 }
 0x250   : > { %2175 = vmatprep.subr.bf16.mxu1 %v3306_v20 }
 0x251   : > { %1879 = vmatpush1.bf16.msra.mxu0 %v3307_v25 }
 0x252   : > { %1880 = vmatprep.subr.bf16.mxu0 %v3315_v27 }
 0x253   : > { %2176 = vmatpush1.bf16.msra.mxu1 %v3304_v22 }
 0x254   : > { %2177 = vmatprep.subr.bf16.mxu1 %v3312_v24 }
 0x255   : > { %1881 = vmatpush1.bf16.msra.mxu0 %v3313_v29 }
 0x256   : > { %1882 = vmatprep.subr.bf16.mxu0 %v3321_v31 }
 0x257   : > { %2178 = vmatpush1.bf16.msra.mxu1 %v3310_v26 }
 0x258   : > { %2179 = vmatprep.subr.bf16.mxu1 %v3318_v28 }
 0x259   : > { %1883 = vmatpush1.bf16.msra.mxu0 %v3319_v32 }
 0x25a   : > { %1884 = vmatprep.subr.bf16.mxu0 %v3327_v35 }
 0x25b   : > { %2180 = vmatpush1.bf16.msra.mxu1 %v3316_v30 }
 0x25c   : > { %2181 = vmatprep.subr.bf16.mxu1 %v3324_v33 }
 0x25d   : > { %1885 = vmatpush1.bf16.msra.mxu0 %v3325_v36 }
 0x25e   : > { %1886 = vmatprep.subr.bf16.mxu0 %v3333_v39 }
 0x25f   : > { %2182 = vmatpush1.bf16.msra.mxu1 %v3322_v34 }
 0x260   : > { %2183 = vmatprep.subr.bf16.mxu1 %v3330_v37 }
 0x261   : > { %1887 = vmatpush1.bf16.msra.mxu0 %v3331_v43 }
 0x262   : > { %1888 = vmatprep.subr.bf16.mxu0 %v3339_v47 }
 0x263   : > { %2184 = vmatpush1.bf16.msra.mxu1 %v3328_v38 }
 0x264   : > { %2185 = vmatprep.subr.bf16.mxu1 %v3336_v45 }
 0x265   : > { %1889 = vmatpush1.bf16.msra.mxu0 %v3337_v49 }
 0x266   : > { %2486 = vmatprep.subr.bf16.mxu0 %v3345_v55 }
 0x267   : > { %2186 = vmatpush1.bf16.msra.mxu1 %v3334_v46 }
 0x268   : > { %2187 = vmatprep.subr.bf16.mxu1 %v3342_v51 }
 0x26b   : > { %2188 = vmatpush1.bf16.msra.mxu1 %v3340_v53 }
 0x2c1   : > { %v4081_v59 = vpop.f32.mrb[16].mxu1  ;;  %v4083_v61 = vpop.f32.mrb[8].mxu0 }
 0x2c2   : > { %v4085_v63 = vpop.f32.mrb[17].mxu1  ;;  %v4087_v1 = vpop.f32.mrb[9].mxu0  ;;  %v1251_v6 = vrot.slane %v4081_v59, 7  ;;  %v1300_v8 = vrot.slane %v4083_v61, 1 }
 0x2c3   : > { %v917_v3 = vpop.f32.mrb[18].mxu1  ;;  %v1216_v4 = vpop.f32.mrb[10].mxu0  ;;  %v1252_v15 = vrot.slane %v4085_v63, 7  ;;  %v4792_v16 = vrot.slane %v4087_v1, 1  ;;  %v4807_v63 = vmov 0 }
 0x2c4   : > { %v1253_v10 = vrot.slane %v917_v3, 7  ;;  %v1302_v12 = vrot.slane %v1216_v4, 1  ;;  %v919_v13 = vpop.f32.mrb[19].mxu1  ;;  %v1218_v14 = vpop.f32.mrb[11].mxu0 }
 0x2c5   : > { %v1254_v17 = vrot.slane %v919_v13, 7  ;;  %v1303_v18 = vrot.slane %v1218_v14, 1 }
 0x2c6   : > { %v4099_v19 = vsel %vm1316_vm2, %v1300_v8, %v1302_v12  ;;  %v4105_v2 = vsel %vm1267_vm1, %v1251_v6, %v1253_v10 }
 0x2c7   : > { %v4111_v20 = vsel %vm1316_vm2, %v4792_v16, %v1303_v18  ;;  %v4117_v21 = vsel %vm1267_vm1, %v1252_v15, %v1254_v17 }
 0x2c9   : > { %v923_v22 = vpop.f32.mrb[20].mxu1  ;;  %v1222_v23 = vpop.f32.mrb[12].mxu0 }
 0x2ca   : > { %v1255_v24 = vrot.slane %v923_v22, 7  ;;  %v1304_v25 = vrot.slane %v1222_v23, 1  ;;  %v925_v26 = vpop.f32.mrb[21].mxu1  ;;  %v1224_v27 = vpop.f32.mrb[13].mxu0 }
 0x2cb   : > { %v1256_v28 = vrot.slane %v925_v26, 7  ;;  %v1305_v29 = vrot.slane %v1224_v27, 1  ;;  %v927_v30 = vpop.f32.mrb[22].mxu1  ;;  %v1226_v31 = vpop.f32.mrb[14].mxu0 }
 0x2cc   : > { %v1257_v32 = vrot.slane %v927_v30, 7  ;;  %v1306_v33 = vrot.slane %v1226_v31, 1  ;;  %v929_v34 = vpop.f32.mrb[23].mxu1  ;;  %v1228_v35 = vpop.f32.mrb[15].mxu0  ;;  %v4121_v36 = vsel %vm1316_vm2, %v1302_v12, %v1304_v25  ;;  %v4125_v37 = vsel %vm1267_vm1, %v1253_v10, %v1255_v24 }
 0x2cd   : > { %v1258_v38 = vrot.slane %v929_v34, 7  ;;  %v1307_v39 = vrot.slane %v1228_v35, 1  ;;  %v4129_v43 = vsel %vm1316_vm2, %v1303_v18, %v1305_v29  ;;  %v4133_v45 = vsel %vm1267_vm1, %v1254_v17, %v1256_v28 }
 0x2ce   : > { %v4137_v46 = vsel %vm1316_vm2, %v1304_v25, %v1306_v33  ;;  %v4141_v47 = vsel %vm1267_vm1, %v1255_v24, %v1257_v32 }
 0x2cf   : > { %v4145_v49 = vsel %vm1316_vm2, %v1305_v29, %v1307_v39  ;;  %v4149_v51 = vsel %vm1267_vm1, %v1256_v28, %v1258_v38 }
 0x2d1   : > { %v933_v53 = vpop.f32.mrb[24].mxu1  ;;  %v1232_v55 = vpop.f32.mrb[16].mxu0 }
 0x2d2   : > { %v1259_v56 = vrot.slane %v933_v53, 7  ;;  %v1308_v3 = vrot.slane %v1232_v55, 1  ;;  %v935_v4 = vpop.f32.mrb[25].mxu1  ;;  %v1234_v10 = vpop.f32.mrb[17].mxu0 }
 0x2d3   : > { %v1260_v12 = vrot.slane %v935_v4, 7  ;;  %v1309_v13 = vrot.slane %v1234_v10, 1  ;;  %v937_v14 = vpop.f32.mrb[26].mxu1  ;;  %v1236_v17 = vpop.f32.mrb[18].mxu0 }
 0x2d4   : > { %v1261_v18 = vrot.slane %v937_v14, 7  ;;  %v1310_v22 = vrot.slane %v1236_v17, 1  ;;  %v939_v23 = vpop.f32.mrb[27].mxu1  ;;  %v1238_v24 = vpop.f32.mrb[19].mxu0  ;;  %v4153_v25 = vsel %vm1316_vm2, %v1306_v33, %v1308_v3  ;;  %v4157_v26 = vsel %vm1267_vm1, %v1257_v32, %v1259_v56 }
 0x2d5   : > { %v1262_v27 = vrot.slane %v939_v23, 7  ;;  %v1311_v28 = vrot.slane %v1238_v24, 1  ;;  %v4161_v29 = vsel %vm1316_vm2, %v1307_v39, %v1309_v13  ;;  %v4169_v31 = vsel %vm1267_vm1, %v1258_v38, %v1260_v12 }
 0x2d6   : > { %v4165_v30 = vsel %vm1316_vm2, %v1308_v3, %v1310_v22  ;;  %v4177_v32 = vsel %vm1267_vm1, %v1259_v56, %v1261_v18 }
 0x2d7   : > { %v4173_v33 = vsel %vm1316_vm2, %v1309_v13, %v1311_v28  ;;  %v4181_v34 = vsel %vm1267_vm1, %v1260_v12, %v1262_v27 }
 0x2d9   : > { %v943_v35 = vpop.f32.mrb[28].mxu1  ;;  %v1242_v39 = vpop.f32.mrb[20].mxu0 }
 0x2da   : > { %v1263_v53 = vrot.slane %v943_v35, 7  ;;  %v1312_v55 = vrot.slane %v1242_v39, 1  ;;  %v945_v3 = vpop.f32.mrb[29].mxu1  ;;  %v1244_v4 = vpop.f32.mrb[21].mxu0 }
 0x2db   : > { %v1264_v38 = vrot.slane %v945_v3, 7  ;;  %v1313_v10 = vrot.slane %v1244_v4, 1  ;;  %v947_v14 = vpop.f32.mrb[30].mxu1  ;;  %v1246_v17 = vpop.f32.mrb[22].mxu0 }
 0x2dc   : > { %v1265_v13 = vrot.slane %v947_v14, 7  ;;  %v1314_v23 = vrot.slane %v1246_v17, 1  ;;  %v949_v24 = vpop.f32.mrb[31].mxu1  ;;  %v1248_v16 = vpop.f32.mrb[23].mxu0  ;;  %v4185_v56 = vsel %vm1316_vm2, %v1310_v22, %v1312_v55  ;;  %v4189_v12 = vsel %vm1267_vm1, %v1261_v18, %v1263_v53 }
 0x2dd   : > { %v1266_v35 = vrot.slane %v949_v24, 7  ;;  %v1315_v39 = vrot.slane %v1248_v16, 1  ;;  %v4193_v3 = vsel %vm1316_vm2, %v1311_v28, %v1313_v10  ;;  %v4197_v4 = vsel %vm1267_vm1, %v1262_v27, %v1264_v38 }
 0x2de   : > { %v1282_v22 = vsel %vm1267_vm1, %v1265_v13, %v1251_v6  ;;  %v4205_v14 = vsel %vm1316_vm2, %v1312_v55, %v1314_v23  ;;  %v4209_v16 = vsel %vm1267_vm1, %v1263_v53, %v1265_v13  ;;  %v4215_v18 = vsel %vm1316_vm2, %v1314_v23, %v1300_v8  ;;  %v1598_v53 = vld [vmem:[%s4788_s4] sm:$0x3] }
 0x2df   : > { %v1283_v59 = vsel %vm1267_vm1, %v1266_v35, %v1252_v15  ;;  %v4223_v6 = vsel %vm1316_vm2, %v1313_v10, %v1315_v39  ;;  %v4227_v27 = vsel %vm1267_vm1, %v1264_v38, %v1266_v35  ;;  %v4806_v28 = vrot.slane %v4087_v1, 1 }
 0x2e0   : > { %v571_v8 = vand.u32 31, %v4079_v57  ;;  %v4793_v15 = vsub.s32 0, %v4079_v57  ;;  %v4796_v55 = vsub.s32 1, %v4079_v57  ;;  %v562_v24 = vadd.s32 24, %v4079_v57 }
 0x2e1   : > { %v4233_v61 = vsel %vm1316_vm2, %v1315_v39, %v4806_v28 }
 0x2e2   : > { %vm4236_vm3 = vcmp.eq.s32.totalorder %v571_v8, 0  ;;  %v4249_v17 = vrot.slane %v1598_v53, %v4793_v15  ;;  %v4256_v39 = vrot.slane %v1598_v53, %v4796_v55 }
 0x2e3   : > { %v4808_v63 = vsel %vm4236_vm3, 4294967295, %v4807_v63  ;;  %v1284_v1 = vsel %vm4236_vm3, 0.0, %v1282_v22  ;;  %v1285_v13 = vsel %vm4236_vm3, 0.0, %v1283_v59  ;;  %v563_v59 = vadd.s32 32, %v4079_v57 }
 0x2e4   : > { %4809 = vst [vmem:[#allocation3_spill] sm:$0xff] %v4808_v63 }
 0x301   : > { %v1543_v38 = vpop.f32.mrb[32].mxu1 }
 0x302   : > { %v1544_v10 = vadd.f32 %v1543_v38, %v1284_v1  ;;  %v1545_v23 = vpop.f32.mrb[33].mxu1 }
 0x303   : > { %v1546_v35 = vadd.f32 %v1545_v23, %v1285_v13  ;;  %v1547_v28 = vpop.f32.mrb[34].mxu1  ;;  %v592_v23 = vand.u32 31, %v562_v24 }
 0x304   : > { %v1582_v22 = vadd.f32 %v1544_v10, %v4099_v19  ;;  %v1548_v8 = vadd.f32 %v1547_v28, %v4105_v2  ;;  %v1549_v1 = vpop.f32.mrb[35].mxu1 }
 0x305   : > { %v1583_v38 = vadd.f32 %v1546_v35, %v4111_v20  ;;  %v1550_v15 = vadd.f32 %v1549_v1, %v4117_v21  ;;  %v599_v35 = vand.u32 31, %v563_v59  ;;  %vm4273_vm4 = vcmp.eq.s32.totalorder %v592_v23, 31 }
 0x306   : > { %v1610_v63 = vadd.f32 %v4249_v17, %v1582_v22  ;;  %v1584_v13 = vadd.f32 %v1548_v8, %v4121_v36 }
 0x307   : > { %v1611_v53 = vadd.f32 %v4256_v39, %v1583_v38  ;;  %v1585_v55 = vadd.f32 %v1550_v15, %v4129_v43  ;;  %v1339_v38 = vsel %vm4273_vm4, 0.0, %v4153_v25  ;;  %vm4298_vm5 = vcmp.eq.s32.totalorder %v599_v35, 0 }
 0x308   : > { %v1626_v11 = vmax.f32 %v1610_v63, 0.0  ;;  %v1612_v19 = vadd.f32 %v4249_v17, %v1584_v13  ;;  %v566_v35 = vadd.s32 56, %v4079_v57 }
 0x309   : > { %v1627_v2 = vmax.f32 %v1611_v53, 0.0  ;;  %v1613_v10 = vadd.f32 %v4256_v39, %v1585_v55  ;;  %v1553_v20 = vpop.f32.mrb[36].mxu1  ;;  %v3348_v53 = vld [vmem:[%s4789_s5 + $0x114] ss:$8 sps:$4 sm:$0xff]  }
 0x30a   : > { %v4270_v21 = vadd.f32 %v1626_v11, %v3718_v40  ;;  %v1628_v28 = vmax.f32 %v1612_v19, 0.0  ;;  %v1554_v22 = vadd.f32 %v1553_v20, %v4125_v37  ;;  %v1555_v36 = vpop.f32.mrb[37].mxu1 }
 0x30b   : > { %v1629_v43 = vmax.f32 %v1613_v10, 0.0  ;;  %v1556_v63 = vadd.f32 %v1555_v36, %v4133_v45  ;;  %v1557_v15 = vpop.f32.mrb[38].mxu1  ;;  %v4279_v8 = vadd.f32 %v1627_v2, %v3720_v41  ;;  %v1292_v10 = vsel %vm4298_vm5, 0.0, %v4157_v26 }
 0x30c   : > { %v4282_v55 = vadd.f32 %v1628_v28, %v3722_v42  ;;  %v1586_v40 = vadd.f32 %v1554_v22, %v4137_v46  ;;  %v1558_v11 = vadd.f32 %v1557_v15, %v4141_v47  ;;  %v1559_v37 = vpop.f32.mrb[39].mxu1  ;;  %v1340_v46 = vsel %vm4273_vm4, 0.0, %v4161_v29 }
 0x30d   : > { %v1587_v1 = vadd.f32 %v1556_v63, %v4145_v49  ;;  %v1560_v45 = vadd.f32 %v1559_v37, %v4149_v51  ;;  %v4292_v59 = vadd.f32 %v1629_v43, %v3728_v44  ;;  %v3343_v44 = vld [vmem:[%s4789_s5 + $0x100] ss:$8 sps:$4 sm:$0xff]   ;;  %v1293_v36 = vsel %vm4298_vm5, 0.0, %v4169_v31 }
 0x30e   : > { %v1614_v41 = vadd.f32 %v4249_v17, %v1586_v40  ;;  %v1588_v42 = vadd.f32 %v1558_v11, %v1339_v38  ;;  %v4312_v25 = vpack.c.bf16 %v4282_v55, %v4270_v21  ;;  %v3346_v11 = vld [vmem:[%s4789_s5 + $0x110] ss:$8 sps:$4 sm:$0xff]  }
 0x30f   : > { %v1615_v49 = vadd.f32 %v4256_v39, %v1587_v1  ;;  %v1589_v13 = vadd.f32 %v1560_v45, %v1340_v46  ;;  %v4305_v51 = vpack.c.bf16 %v4292_v59, %v4279_v8  ;;  %v620_v46 = vand.u32 31, %v566_v35 }
 0x310   : > { %v1630_v29 = vmax.f32 %v1614_v41, 0.0  ;;  %v1616_v23 = vadd.f32 %v4249_v17, %v1588_v42 }
 0x311   : > { %v1631_v19 = vmax.f32 %v1615_v49, 0.0  ;;  %v1617_v2 = vadd.f32 %v4256_v39, %v1589_v13  ;;  %v1563_v20 = vpop.f32.mrb[40].mxu1  ;;  %1890 = vmatprep.mubr.bf16.mxu0 %v4305_v51  ;;  %2189 = vmatprep.mubr.bf16.mxu1 %v4305_v51  ;;  %vm4377_vm6 = vcmp.eq.s32.totalorder %v620_v46, 31  ;;  %v3358_v46 = vld [vmem:[%s4789_s5 + $0x150] ss:$8 sps:$4 sm:$0xff]  }
 0x312   : > { %v1632_v28 = vmax.f32 %v1616_v23, 0.0  ;;  %v1564_v22 = vadd.f32 %v1563_v20, %v1292_v10  ;;  %v1565_v43 = vpop.f32.mrb[41].mxu1  ;;  %1891 = vmatmul.mubr.bf16.vlgmr.msra.gmra.mrb[24].mxu0 %v4312_v25  ;;  %2190 = vmatmul.mubr.bf16.vlgmr.msra.gmra.mrb[48].mxu1 %v4312_v25  ;;  %v4331_v26 = vadd.f32 %v1630_v29, %v3740_v48  ;;  %v3351_v48 = vld [vmem:[%s4789_s5 + $0x124] ss:$8 sps:$4 sm:$0xff]  }
 0x313   : > { %v1633_v63 = vmax.f32 %v1617_v2, 0.0  ;;  %v1566_v15 = vadd.f32 %v1565_v43, %v1293_v36  ;;  %2487 = vmatpush1.bf16.msra.mxu0 %v3343_v44  ;;  %v1567_v40 = vpop.f32.mrb[42].mxu1  ;;  %v4337_v37 = vadd.f32 %v1631_v19, %v3745_v50 }
 0x314   : > { %v1590_v31 = vadd.f32 %v1564_v22, %v4165_v30  ;;  %v1568_v1 = vadd.f32 %v1567_v40, %v4177_v32  ;;  %v1569_v38 = vpop.f32.mrb[43].mxu1  ;;  %2488 = vmatprep.subr.bf16.mxu0 %v3348_v53  ;;  %v4345_v45 = vadd.f32 %v1632_v28, %v3750_v52 }
 0x315   : > { %v1591_v41 = vadd.f32 %v1566_v15, %v4173_v33  ;;  %v1570_v42 = vadd.f32 %v1569_v38, %v4181_v34  ;;  %v4350_v50 = vadd.f32 %v1633_v63, %v3756_v54  ;;  %v3349_v33 = vld [vmem:[%s4789_s5 + $0x120] ss:$8 sps:$4 sm:$0xff]  }
 0x316   : > { %v1618_v30 = vadd.f32 %v4249_v17, %v1590_v31  ;;  %v1592_v32 = vadd.f32 %v1568_v1, %v4185_v56  ;;  %v4366_v56 = vpack.c.bf16 %v4345_v45, %v4331_v26  ;;  %v1348_v1 = vsel %vm4377_vm6, 0.0, %v4233_v61  ;;  %v3360_v61 = vld [vmem:[%s4789_s5 + $0x154] ss:$8 sps:$4 sm:$0xff]  }
 0x317   : > { %v1619_v49 = vadd.f32 %v4256_v39, %v1591_v41  ;;  %v1593_v13 = vadd.f32 %v1570_v42, %v4193_v3  ;;  %2489 = vmatpush1.bf16.msra.mxu0 %v3346_v11  ;;  %v4358_v52 = vpack.c.bf16 %v4350_v50, %v4337_v37  ;;  %v3354_v3 = vld [vmem:[%s4789_s5 + $0x134] ss:$8 sps:$4 sm:$0xff]  }
 0x318   : > { %v1634_v54 = vmax.f32 %v1618_v30, 0.0  ;;  %v1620_v34 = vadd.f32 %v4249_v17, %v1592_v32  ;;  %2490 = vmatprep.subr.bf16.mxu0 %v3351_v48 }
 0x319   : > { %v1635_v44 = vmax.f32 %v1619_v49, 0.0  ;;  %v1621_v29 = vadd.f32 %v4256_v39, %v1593_v13  ;;  %v1573_v23 = vpop.f32.mrb[44].mxu1  ;;  %1900 = vmatprep.mubr.bf16.mxu0 %v4358_v52  ;;  %2199 = vmatprep.mubr.bf16.mxu1 %v4358_v52  ;;  %v3363_v49 = vld [vmem:[%s4789_s5 + $0x164] ss:$8 sps:$4 sm:$0xff]  }
 0x31a   : > { %v1636_v53 = vmax.f32 %v1620_v34, 0.0  ;;  %v1574_v19 = vadd.f32 %v1573_v23, %v4189_v12  ;;  %v1575_v2 = vpop.f32.mrb[45].mxu1  ;;  %1901 = vmatmul.mubr.bf16.gmra.mrb[28].mxu0 %v4366_v56  ;;  %2200 = vmatmul.mubr.bf16.gmra.mrb[52].mxu1 %v4366_v56  ;;  %v4382_v20 = vadd.f32 %v1634_v54, %v3772_v58  ;;  %v3352_v12 = vld [vmem:[%s4789_s5 + $0x130] ss:$8 sps:$4 sm:$0xff]   ;;  %v3357_v58 = vld [vmem:[%s4789_s5 + $0x144] ss:$8 sps:$4 sm:$0xff]  }
 0x31b   : > { %v1637_v35 = vmax.f32 %v1621_v29, 0.0  ;;  %v1576_v28 = vadd.f32 %v1575_v2, %v4197_v4  ;;  %2491 = vmatpush1.bf16.msra.mxu0 %v3349_v33  ;;  %v1577_v22 = vpop.f32.mrb[46].mxu1  ;;  %v4389_v36 = vadd.f32 %v1635_v44, %v3777_v60  ;;  %v1347_v60 = vsel %vm4377_vm6, 0.0, %v4215_v18  ;;  %v4818_v33 = vld [vmem:[#allocation2_spill] sm:$0xff]  ;;  %v3372_v23 = vld [vmem:[%s4789_s5 + $0x194] ss:$8 sps:$4 sm:$0xff]  }
 0x31c   : > { %v1594_v43 = vadd.f32 %v1574_v19, %v4205_v14  ;;  %v1578_v63 = vadd.f32 %v1577_v22, %v4209_v16  ;;  %v1579_v15 = vpop.f32.mrb[47].mxu1  ;;  %2492 = vmatprep.subr.bf16.mxu0 %v3354_v3  ;;  %v4397_v4 = vadd.f32 %v1636_v53, %v3782_v62  ;;  %v3364_v3 = vld [vmem:[%s4789_s5 + $0x170] ss:$8 sps:$4 sm:$0xff]   ;;  %v3369_v44 = vld [vmem:[%s4789_s5 + $0x184] ss:$8 sps:$4 sm:$0xff]  }
 0x31d   : > { %v1595_v40 = vadd.f32 %v1576_v28, %v4223_v6  ;;  %v1580_v11 = vadd.f32 %v1579_v15, %v4227_v27  ;;  %v4405_v14 = vadd.f32 %v1637_v35, %v3788_v0  ;;  %v3355_v0 = vld [vmem:[%s4789_s5 + $0x140] ss:$8 sps:$4 sm:$0xff]   ;;  %v3375_v53 = vld [vmem:[%s4789_s5 + $0x1a4] ss:$8 sps:$4 sm:$0xff]   ;;  %v3378_v2 = vld [vmem:[%s4789_s5 + $0x1b4] ss:$8 sps:$4 sm:$0xff]  }
 0x31e   : > { %v1622_v16 = vadd.f32 %v4249_v17, %v1594_v43  ;;  %v1596_v31 = vadd.f32 %v1578_v63, %v1347_v60  ;;  %v4422_v48 = vpack.c.bf16 %v4397_v4, %v4382_v20  ;;  %v3367_v29 = vld [vmem:[%s4789_s5 + $0x180] ss:$8 sps:$4 sm:$0xff]   ;;  %v3376_v35 = vld [vmem:[%s4789_s5 + $0x1b0] ss:$8 sps:$4 sm:$0xff]   ;;  %v3381_v28 = vld [vmem:[%s4789_s5 + $0x1c4] ss:$8 sps:$4 sm:$0xff]  }
 0x31f   : > { %v1623_v62 = vadd.f32 %v4256_v39, %v1595_v40  ;;  %v1597_v38 = vadd.f32 %v1580_v11, %v1348_v1  ;;  %2493 = vmatpush1.bf16.msra.mxu0 %v3352_v12  ;;  %v4414_v6 = vpack.c.bf16 %v4405_v14, %v4389_v36  ;;  %v3373_v19 = vld [vmem:[%s4789_s5 + $0x1a0] ss:$8 sps:$4 sm:$0xff]   ;;  %v3384_v12 = vld [vmem:[%s4789_s5 + $0x1d4] ss:$8 sps:$4 sm:$0xff]   ;;  %v3382_v43 = vld [vmem:[%s4789_s5 + $0x1d0] ss:$8 sps:$4 sm:$0xff]  }
 0x320   : > { %v1638_v18 = vmax.f32 %v1622_v16, 0.0  ;;  %v1624_v27 = vadd.f32 %v4249_v17, %v1596_v31  ;;  %2494 = vmatprep.subr.bf16.mxu0 %v3357_v58  ;;  %v3379_v22 = vld [vmem:[%s4789_s5 + $0x1c0] ss:$8 sps:$4 sm:$0xff]   ;;  %v3387_v63 = vld [vmem:[%s4789_s5 + $0x1e4] ss:$8 sps:$4 sm:$0xff]  }
 0x321   : > { %v1639_v41 = vmax.f32 %v1623_v62, 0.0  ;;  %v1625_v42 = vadd.f32 %v4256_v39, %v1597_v38  ;;  %1910 = vmatprep.mubr.bf16.mxu0 %v4414_v6  ;;  %2209 = vmatprep.mubr.bf16.mxu1 %v4414_v6  ;;  %v3385_v15 = vld [vmem:[%s4789_s5 + $0x1e0] ss:$8 sps:$4 sm:$0xff]   ;;  %v3390_v58 = vld [vmem:[%s4789_s5 + $0x1f4] ss:$8 sps:$4 sm:$0xff]  }
 0x322   : > { %v1640_v30 = vmax.f32 %v1624_v27, 0.0  ;;  %1911 = vmatmul.mubr.bf16.gmra.mrb[32].mxu0 %v4422_v48  ;;  %2210 = vmatmul.mubr.bf16.gmra.mrb[56].mxu1 %v4422_v48  ;;  %v4433_v17 = vadd.f32 %v1638_v18, %v3804_v5  ;;  %v3388_v40 = vld [vmem:[%s4789_s5 + $0x1f0] ss:$8 sps:$4 sm:$0xff]  }
 0x323   : > { %v1641_v32 = vmax.f32 %v1625_v42, 0.0  ;;  %2495 = vmatpush1.bf16.msra.mxu0 %v3355_v0  ;;  %v4439_v39 = vadd.f32 %v1639_v41, %v3809_v7  ;;  %v3361_v7 = vld [vmem:[%s4789_s5 + $0x160] ss:$8 sps:$4 sm:$0xff]  }
 0x324   : > { %2496 = vmatprep.subr.bf16.mxu0 %v3360_v61  ;;  %v4445_v13 = vadd.f32 %v1640_v30, %v3814_v9  ;;  %v3366_v9 = vld [vmem:[%s4789_s5 + $0x174] ss:$8 sps:$4 sm:$0xff]  }
 0x325   : > { %4816 = vst [vmem:[#allocation4_spill] sm:$0xff] %v4439_v39  ;;  %v4448_v5 = vadd.f32 %v1641_v32, %v4818_v33 }
 0x326   : > { %4817 = vst [vmem:[#allocation5_spill] sm:$0xff] %v4445_v13  ;;  %v1664_v34 = vpack.c.bf16 %v4445_v13, %v4433_v17 }
 0x327   : > { %4819 = vst [vmem:[#allocation2_spill] sm:$0xff] %v4448_v5  ;;  %2497 = vmatpush1.bf16.msra.mxu0 %v3358_v46  ;;  %v1665_v54 = vpack.c.bf16 %v4448_v5, %v4439_v39 }
 0x328   : > { %2498 = vmatprep.subr.bf16.mxu0 %v3363_v49 }
 0x329   : > { %1920 = vmatprep.mubr.bf16.mxu0 %v1665_v54  ;;  %2219 = vmatprep.mubr.bf16.mxu1 %v1665_v54 }
 0x32a   : > { %1921 = vmatmul.mubr.bf16.gmra.mrb[36].mxu0 %v1664_v34  ;;  %2220 = vmatmul.mubr.bf16.gmra.mrb[60].mxu1 %v1664_v34 }
 0x32b   : > { %2499 = vmatpush1.bf16.msra.mxu0 %v3361_v7  ;;  %2518 = vmatprep.mubr.bf16.mxu0 %v4305_v51  ;;  %v3370_v51 = vld [vmem:[%s4789_s5 + $0x190] ss:$8 sps:$4 sm:$0xff]  }
 0x32c   : > { %2500 = vmatprep.subr.bf16.mxu0 %v3366_v9 }
 0x32d   : > { %v4828_v10 = vld [vmem:[#allocation5_spill] sm:$0xff] }
 0x32f   : > { %2501 = vmatpush1.bf16.msra.mxu0 %v3364_v3 }
 0x330   : > { %2502 = vmatprep.subr.bf16.mxu0 %v3369_v44 }
 0x333   : > { %2503 = vmatpush1.bf16.msra.mxu0 %v3367_v29 }
 0x334   : > { %2504 = vmatprep.subr.bf16.mxu0 %v3372_v23 }
 0x337   : > { %2505 = vmatpush1.bf16.msra.mxu0 %v3370_v51 }
 0x338   : > { %2506 = vmatprep.subr.bf16.mxu0 %v3375_v53 }
 0x33b   : > { %2507 = vmatpush1.bf16.msra.mxu0 %v3373_v19 }
 0x33c   : > { %2508 = vmatprep.subr.bf16.mxu0 %v3378_v2 }
 0x33f   : > { %2509 = vmatpush1.bf16.msra.mxu0 %v3376_v35 }
 0x340   : > { %2510 = vmatprep.subr.bf16.mxu0 %v3381_v28 }
 0x343   : > { %2511 = vmatpush1.bf16.msra.mxu0 %v3379_v22 }
 0x344   : > { %2512 = vmatprep.subr.bf16.mxu0 %v3384_v12 }
 0x347   : > { %2513 = vmatpush1.bf16.msra.mxu0 %v3382_v43 }
 0x348   : > { %2514 = vmatprep.subr.bf16.mxu0 %v3387_v63 }
 0x34b   : > { %2515 = vmatpush1.bf16.msra.mxu0 %v3385_v15 }
 0x34c   : > { %2516 = vmatprep.subr.bf16.mxu0 %v3390_v58 }
 0x34f   : > { %2517 = vmatpush1.bf16.msra.mxu0 %v3388_v40 }
 0x352   : > { %2519 = vmatmul.mubr.bf16.vlgmr.msra.gmra.mrb[40].mxu0 %v4312_v25 }
 0x353   : > { %2528 = vmatprep.mubr.bf16.mxu0 %v4358_v52 }
 0x35a   : > { %2529 = vmatmul.mubr.bf16.gmra.mrb[44].mxu0 %v4366_v56 }
 0x35b   : > { %2538 = vmatprep.mubr.bf16.mxu0 %v4414_v6 }
 0x362   : > { %2539 = vmatmul.mubr.bf16.gmra.mrb[48].mxu0 %v4422_v48 }
 0x363   : > { %2548 = vmatprep.mubr.bf16.mxu0 %v1665_v54 }
 0x36a   : > { %2549 = vmatmul.mubr.bf16.gmra.mrb[52].mxu0 %v1664_v34 }
 0x3e5   : > { %v4517_v60 = vpop.f32.mrb[24].mxu0  ;;  %v4519_v11 = vpop.f32.mrb[48].mxu1 }
 0x3e6   : > { %v4521_v16 = vpop.f32.mrb[25].mxu0  ;;  %v4523_v31 = vpop.f32.mrb[49].mxu1  ;;  %v4801_v52 = vrot.slane %v4517_v60, 7  ;;  %v4800_v56 = vrot.slane %v4519_v11, 1 }
 0x3e7   : > { %v1896_v1 = vpop.f32.mrb[26].mxu0  ;;  %v2195_v25 = vpop.f32.mrb[50].mxu1  ;;  %v4798_v18 = vrot.slane %v4521_v16, 7  ;;  %v4799_v27 = vrot.slane %v4523_v31, 1 }
 0x3e8   : > { %v2232_v62 = vrot.slane %v1896_v1, 7  ;;  %v2280_v38 = vrot.slane %v2195_v25, 1  ;;  %v1898_v6 = vpop.f32.mrb[27].mxu0  ;;  %v2197_v0 = vpop.f32.mrb[51].mxu1 }
 0x3e9   : > { %v2233_v48 = vrot.slane %v1898_v6, 7  ;;  %v2281_v61 = vrot.slane %v2197_v0, 1 }
 0x3ea   : > { %v4533_v41 = vsel %vm1316_vm2, %v4800_v56, %v2280_v38  ;;  %v4539_v42 = vsel %vm1267_vm1, %v4801_v52, %v2232_v62 }
 0x3eb   : > { %v4545_v30 = vsel %vm1316_vm2, %v4799_v27, %v2281_v61  ;;  %v4551_v32 = vsel %vm1267_vm1, %v4798_v18, %v2233_v48 }
 0x3ed   : > { %v1902_v46 = vpop.f32.mrb[28].mxu0  ;;  %v2201_v49 = vpop.f32.mrb[52].mxu1 }
 0x3ee   : > { %v2234_v33 = vrot.slane %v1902_v46, 7  ;;  %v2282_v54 = vrot.slane %v2201_v49, 1  ;;  %v1904_v7 = vpop.f32.mrb[29].mxu0  ;;  %v2203_v34 = vpop.f32.mrb[53].mxu1 }
 0x3ef   : > { %v2235_v9 = vrot.slane %v1904_v7, 7  ;;  %v2283_v3 = vrot.slane %v2203_v34, 1  ;;  %v1906_v44 = vpop.f32.mrb[30].mxu0  ;;  %v2205_v29 = vpop.f32.mrb[54].mxu1 }
 0x3f0   : > { %v2236_v23 = vrot.slane %v1906_v44, 7  ;;  %v2284_v51 = vrot.slane %v2205_v29, 1  ;;  %v1908_v53 = vpop.f32.mrb[31].mxu0  ;;  %v2207_v19 = vpop.f32.mrb[55].mxu1  ;;  %v4555_v2 = vsel %vm1316_vm2, %v2280_v38, %v2282_v54  ;;  %v4559_v35 = vsel %vm1267_vm1, %v2232_v62, %v2234_v33 }
 0x3f1   : > { %v2237_v28 = vrot.slane %v1908_v53, 7  ;;  %v2285_v22 = vrot.slane %v2207_v19, 1  ;;  %v4563_v12 = vsel %vm1316_vm2, %v2281_v61, %v2283_v3  ;;  %v4567_v43 = vsel %vm1267_vm1, %v2233_v48, %v2235_v9 }
 0x3f2   : > { %v4571_v63 = vsel %vm1316_vm2, %v2282_v54, %v2284_v51  ;;  %v4575_v15 = vsel %vm1267_vm1, %v2234_v33, %v2236_v23 }
 0x3f3   : > { %v4579_v58 = vsel %vm1316_vm2, %v2283_v3, %v2285_v22  ;;  %v4583_v40 = vsel %vm1267_vm1, %v2235_v9, %v2237_v28 }
 0x3f5   : > { %v1912_v1 = vpop.f32.mrb[32].mxu0  ;;  %v2211_v25 = vpop.f32.mrb[56].mxu1 }
 0x3f6   : > { %v2238_v62 = vrot.slane %v1912_v1, 7  ;;  %v2286_v38 = vrot.slane %v2211_v25, 1  ;;  %v1914_v6 = vpop.f32.mrb[33].mxu0  ;;  %v2213_v0 = vpop.f32.mrb[57].mxu1 }
 0x3f7   : > { %v2239_v48 = vrot.slane %v1914_v6, 7  ;;  %v2287_v61 = vrot.slane %v2213_v0, 1  ;;  %v1916_v46 = vpop.f32.mrb[34].mxu0  ;;  %v2215_v49 = vpop.f32.mrb[58].mxu1 }
 0x3f8   : > { %v2240_v33 = vrot.slane %v1916_v46, 7  ;;  %v2288_v54 = vrot.slane %v2215_v49, 1  ;;  %v1918_v7 = vpop.f32.mrb[35].mxu0  ;;  %v2217_v34 = vpop.f32.mrb[59].mxu1  ;;  %v4587_v3 = vsel %vm1316_vm2, %v2284_v51, %v2286_v38  ;;  %v4591_v9 = vsel %vm1267_vm1, %v2236_v23, %v2238_v62 }
 0x3f9   : > { %v2241_v44 = vrot.slane %v1918_v7, 7  ;;  %v2289_v29 = vrot.slane %v2217_v34, 1  ;;  %v4595_v53 = vsel %vm1316_vm2, %v2285_v22, %v2287_v61  ;;  %v4603_v1 = vsel %vm1267_vm1, %v2237_v28, %v2239_v48 }
 0x3fa   : > { %v4599_v19 = vsel %vm1316_vm2, %v2286_v38, %v2288_v54  ;;  %v4611_v23 = vsel %vm1267_vm1, %v2238_v62, %v2240_v33 }
 0x3fb   : > { %v4607_v51 = vsel %vm1316_vm2, %v2287_v61, %v2289_v29  ;;  %v4615_v22 = vsel %vm1267_vm1, %v2239_v48, %v2241_v44 }
 0x3fd   : > { %v1922_v25 = vpop.f32.mrb[36].mxu0  ;;  %v2221_v6 = vpop.f32.mrb[60].mxu1 }
 0x3fe   : > { %v2242_v38 = vrot.slane %v1922_v25, 7  ;;  %v2290_v0 = vrot.slane %v2221_v6, 1  ;;  %v1924_v46 = vpop.f32.mrb[37].mxu0  ;;  %v2223_v49 = vpop.f32.mrb[61].mxu1 }
 0x3ff   : > { %v2243_v28 = vrot.slane %v1924_v46, 7  ;;  %v2291_v7 = vrot.slane %v2223_v49, 1  ;;  %v1926_v34 = vpop.f32.mrb[38].mxu0  ;;  %v2225_v18 = vpop.f32.mrb[62].mxu1  ;;  %v4820_v49 = vrot.slane %v4517_v60, 7 }
 0x400   : > { %v2244_v61 = vrot.slane %v1926_v34, 7  ;;  %v2292_v27 = vrot.slane %v2225_v18, 1  ;;  %v1928_v56 = vpop.f32.mrb[39].mxu0  ;;  %v2227_v62 = vpop.f32.mrb[63].mxu1  ;;  %v4619_v52 = vsel %vm1316_vm2, %v2288_v54, %v2290_v0  ;;  %v4623_v48 = vsel %vm1267_vm1, %v2240_v33, %v2242_v38 }
 0x401   : > { %v2245_v25 = vrot.slane %v1928_v56, 7  ;;  %v2293_v6 = vrot.slane %v2227_v62, 1  ;;  %v4627_v46 = vsel %vm1316_vm2, %v2289_v29, %v2291_v7  ;;  %v4631_v18 = vsel %vm1267_vm1, %v2241_v44, %v2243_v28 }
 0x402   : > { %v2260_v54 = vsel %vm1267_vm1, %v2244_v61, %v4820_v49  ;;  %v4639_v34 = vsel %vm1316_vm2, %v2290_v0, %v2292_v27  ;;  %v4643_v56 = vsel %vm1267_vm1, %v2242_v38, %v2244_v61  ;;  %v4821_v33 = vrot.slane %v4519_v11, 1 }
 0x403   : > { %v4822_v44 = vrot.slane %v4523_v31, 1  ;;  %v4823_v62 = vrot.slane %v4521_v16, 7  ;;  %v4663_v38 = vsel %vm1316_vm2, %v2291_v7, %v2293_v6  ;;  %v4667_v11 = vsel %vm1267_vm1, %v2243_v28, %v2245_v25  ;;  %v2575_v31 = vld [vmem:[%s4790_s6] sm:$0x3] }
 0x404   : > { %v4649_v29 = vsel %vm1316_vm2, %v2292_v27, %v4821_v33  ;;  %v2262_v16 = vsel %vm4236_vm3, 0.0, %v2260_v54  ;;  %v4825_v7 = vsub.s32 0, %v4079_v57 }
 0x405   : > { %v4655_v60 = vsel %vm1316_vm2, %v2293_v6, %v4822_v44  ;;  %v2261_v0 = vsel %vm1267_vm1, %v2245_v25, %v4823_v62  ;;  %v4826_v44 = vsub.s32 1, %v4079_v57 }
 0x406   : > { %v4678_v6 = vrot.slane %v2575_v31, %v4825_v7  ;;  %v2263_v28 = vsel %vm4236_vm3, 0.0, %v2261_v0 }
 0x407   : > { %v4684_v62 = vrot.slane %v2575_v31, %v4826_v44 }
 0x425   : > { %v2520_v61 = vpop.f32.mrb[40].mxu0 }
 0x426   : > { %v2521_v49 = vadd.f32 %v2520_v61, %v2262_v16  ;;  %v2522_v25 = vpop.f32.mrb[41].mxu0 }
 0x427   : > { %v2523_v33 = vadd.f32 %v2522_v25, %v2263_v28  ;;  %v2524_v5 = vpop.f32.mrb[42].mxu0 }
 0x428   : > { %v2559_v13 = vadd.f32 %v2521_v49, %v4533_v41  ;;  %v2525_v54 = vadd.f32 %v2524_v5, %v4539_v42  ;;  %v2526_v39 = vpop.f32.mrb[43].mxu0 }
 0x429   : > { %v2560_v16 = vadd.f32 %v2523_v33, %v4545_v30  ;;  %v2527_v61 = vadd.f32 %v2526_v39, %v4551_v32 }
 0x42a   : > { %v2587_v27 = vadd.f32 %v4678_v6, %v2559_v13  ;;  %v2561_v0 = vadd.f32 %v2525_v54, %v4555_v2 }
 0x42b   : > { %v2588_v7 = vadd.f32 %v4684_v62, %v2560_v16  ;;  %v2562_v57 = vadd.f32 %v2527_v61, %v4563_v12 }
 0x42c   : > { %v2603_v31 = vmax.f32 %v2587_v27, 0.0  ;;  %v2589_v28 = vadd.f32 %v4678_v6, %v2561_v0 }
 0x42d   : > { %v2604_v5 = vmax.f32 %v2588_v7, 0.0  ;;  %v2590_v39 = vadd.f32 %v4684_v62, %v2562_v57  ;;  %v2530_v13 = vpop.f32.mrb[44].mxu0 }
 0x42e   : > { %v2619_v41 = vadd.f32 %v2603_v31, %v4270_v21  ;;  %v2605_v42 = vmax.f32 %v2589_v28, 0.0  ;;  %v2531_v30 = vadd.f32 %v2530_v13, %v4559_v35  ;;  %v2532_v32 = vpop.f32.mrb[45].mxu0  ;;  %v2271_v31 = vsel %vm4298_vm5, 0.0, %v4603_v1 }
 0x42f   : > { %v2620_v2 = vadd.f32 %v2604_v5, %v4279_v8  ;;  %v2606_v12 = vmax.f32 %v2590_v39, 0.0  ;;  %v2533_v49 = vadd.f32 %v2532_v32, %v4567_v43  ;;  %v2534_v25 = vpop.f32.mrb[46].mxu0  ;;  %v2316_v8 = vsel %vm4273_vm4, 0.0, %v4587_v3 }
 0x430   : > { %2635 = vst [vmem:[%s4698_s17] sm:$0xff] %v2619_v41  ;;  %v2621_v33 = vadd.f32 %v2605_v42, %v4282_v55  ;;  %v2563_v44 = vadd.f32 %v2531_v30, %v4571_v63  ;;  %v2535_v54 = vadd.f32 %v2534_v25, %v4575_v15  ;;  %v2536_v21 = vpop.f32.mrb[47].mxu0  ;;  %v2317_v63 = vsel %vm4273_vm4, 0.0, %v4595_v53 }
 0x431   : > { %2636 = vst [vmem:[%s4698_s17 + $0x8] sm:$0xff] %v2620_v2  ;;  %v2622_v35 = vadd.f32 %v2606_v12, %v4292_v59  ;;  %v2564_v16 = vadd.f32 %v2533_v49, %v4579_v58  ;;  %v2537_v43 = vadd.f32 %v2536_v21, %v4583_v40  ;;  %v2270_v40 = vsel %vm4298_vm5, 0.0, %v4591_v9 }
 0x432   : > { %2637 = vst [vmem:[%s4698_s17 + $0x10] sm:$0xff] %v2621_v33  ;;  %v2591_v61 = vadd.f32 %v4678_v6, %v2563_v44  ;;  %v2565_v55 = vadd.f32 %v2535_v54, %v2316_v8 }
 0x433   : > { %2638 = vst [vmem:[%s4698_s17 + $0x18] sm:$0xff] %v2622_v35  ;;  %v2592_v15 = vadd.f32 %v4684_v62, %v2564_v16  ;;  %v2566_v59 = vadd.f32 %v2537_v43, %v2317_v63 }
 0x434   : > { %v2607_v58 = vmax.f32 %v2591_v61, 0.0  ;;  %v2593_v27 = vadd.f32 %v4678_v6, %v2565_v55 }
 0x435   : > { %v2608_v0 = vmax.f32 %v2592_v15, 0.0  ;;  %v2594_v3 = vadd.f32 %v4684_v62, %v2566_v59  ;;  %v2540_v7 = vpop.f32.mrb[48].mxu0  ;;  %v4827_v59 = vld [vmem:[#allocation4_spill] sm:$0xff] }
 0x436   : > { %v2623_v24 = vadd.f32 %v2607_v58, %v4331_v26  ;;  %v2609_v53 = vmax.f32 %v2593_v27, 0.0  ;;  %v2541_v57 = vadd.f32 %v2540_v7, %v2270_v40  ;;  %v2542_v28 = vpop.f32.mrb[49].mxu0 }
 0x437   : > { %v2624_v5 = vadd.f32 %v2608_v0, %v4337_v37  ;;  %v2610_v39 = vmax.f32 %v2594_v3, 0.0  ;;  %v2543_v13 = vadd.f32 %v2542_v28, %v2271_v31  ;;  %v2544_v41 = vpop.f32.mrb[50].mxu0  ;;  %v4829_v0 = vld [vmem:[#allocation2_spill] sm:$0xff] }
 0x438   : > { %2639 = vst [vmem:[%s4698_s17 + $0x20] sm:$0xff] %v2623_v24  ;;  %v2625_v9 = vadd.f32 %v2609_v53, %v4345_v45  ;;  %v2567_v42 = vadd.f32 %v2541_v57, %v4599_v19  ;;  %v2545_v26 = vadd.f32 %v2544_v41, %v4611_v23  ;;  %v2546_v30 = vpop.f32.mrb[51].mxu0 }
 0x439   : > { %2640 = vst [vmem:[%s4698_s17 + $0x28] sm:$0xff] %v2624_v5  ;;  %v2626_v47 = vadd.f32 %v2610_v39, %v4350_v50  ;;  %v2568_v1 = vadd.f32 %v2543_v13, %v4607_v51  ;;  %v2547_v32 = vadd.f32 %v2546_v30, %v4615_v22 }
 0x43a   : > { %2641 = vst [vmem:[%s4698_s17 + $0x30] sm:$0xff] %v2625_v9  ;;  %v2595_v37 = vadd.f32 %v4678_v6, %v2567_v42  ;;  %v2569_v2 = vadd.f32 %v2545_v26, %v4619_v52 }
 0x43b   : > { %2642 = vst [vmem:[%s4698_s17 + $0x38] sm:$0xff] %v2626_v47  ;;  %v2596_v45 = vadd.f32 %v4684_v62, %v2568_v1  ;;  %v2570_v19 = vadd.f32 %v2547_v32, %v4627_v46 }
 0x43c   : > { %v2611_v23 = vmax.f32 %v2595_v37, 0.0  ;;  %v2597_v12 = vadd.f32 %v4678_v6, %v2569_v2 }
 0x43d   : > { %v2612_v49 = vmax.f32 %v2596_v45, 0.0  ;;  %v2598_v50 = vadd.f32 %v4684_v62, %v2570_v19  ;;  %v2550_v51 = vpop.f32.mrb[52].mxu0 }
 0x43e   : > { %v2627_v22 = vadd.f32 %v2611_v23, %v4382_v20  ;;  %v2613_v25 = vmax.f32 %v2597_v12, 0.0  ;;  %v2551_v33 = vadd.f32 %v2550_v51, %v4623_v48  ;;  %v2552_v52 = vpop.f32.mrb[53].mxu0 }
 0x43f   : > { %v2628_v44 = vadd.f32 %v2612_v49, %v4389_v36  ;;  %v2614_v54 = vmax.f32 %v2598_v50, 0.0  ;;  %v2553_v46 = vadd.f32 %v2552_v52, %v4631_v18  ;;  %v2554_v21 = vpop.f32.mrb[54].mxu0  ;;  %v2324_v36 = vsel %vm4377_vm6, 0.0, %v4649_v29 }
 0x440   : > { %2643 = vst [vmem:[%s4698_s17 + $0x40] sm:$0xff] %v2627_v22  ;;  %v2629_v35 = vadd.f32 %v2613_v25, %v4397_v4  ;;  %v2571_v16 = vadd.f32 %v2551_v33, %v4639_v34  ;;  %v2555_v8 = vadd.f32 %v2554_v21, %v4643_v56  ;;  %v2556_v20 = vpop.f32.mrb[55].mxu0  ;;  %v2325_v56 = vsel %vm4377_vm6, 0.0, %v4655_v60 }
 0x441   : > { %2644 = vst [vmem:[%s4698_s17 + $0x48] sm:$0xff] %v2628_v44  ;;  %v2630_v48 = vadd.f32 %v2614_v54, %v4405_v14  ;;  %v2572_v43 = vadd.f32 %v2553_v46, %v4663_v38  ;;  %v2557_v18 = vadd.f32 %v2556_v20, %v4667_v11 }
 0x442   : > { %2645 = vst [vmem:[%s4698_s17 + $0x50] sm:$0xff] %v2629_v35  ;;  %v2599_v4 = vadd.f32 %v4678_v6, %v2571_v16  ;;  %v2573_v34 = vadd.f32 %v2555_v8, %v2324_v36 }
 0x443   : > { %2646 = vst [vmem:[%s4698_s17 + $0x58] sm:$0xff] %v2630_v48  ;;  %v2600_v14 = vadd.f32 %v4684_v62, %v2572_v43  ;;  %v2574_v38 = vadd.f32 %v2557_v18, %v2325_v56 }
 0x444   : > { %v2615_v61 = vmax.f32 %v2599_v4, 0.0  ;;  %v2601_v29 = vadd.f32 %v4678_v6, %v2573_v34 }
 0x445   : > { %v2616_v11 = vmax.f32 %v2600_v14, 0.0  ;;  %v2602_v55 = vadd.f32 %v4684_v62, %v2574_v38 }
 0x446   : > { %v2631_v63 = vadd.f32 %v2615_v61, %v4433_v17  ;;  %v2617_v15 = vmax.f32 %v2601_v29, 0.0 }
 0x447   : > { %v2632_v58 = vadd.f32 %v2616_v11, %v4827_v59  ;;  %v2618_v27 = vmax.f32 %v2602_v55, 0.0 }
 0x448   : > { %2647 = vst [vmem:[%s4698_s17 + $0x60] sm:$0xff] %v2631_v63  ;;  %v2633_v60 = vadd.f32 %v2617_v15, %v4828_v10 }
 0x449   : > { %2648 = vst [vmem:[%s4698_s17 + $0x68] sm:$0xff] %v2632_v58  ;;  %v2634_v3 = vadd.f32 %v2618_v27, %v4829_v0 }
 0x44a   : > { %2649 = vst [vmem:[%s4698_s17 + $0x70] sm:$0xff] %v2633_v60 }
 0x44b   : > { %2650 = vst [vmem:[%s4698_s17 + $0x78] sm:$0xff] %v2634_v3 }
 0x44c PF: > { %s17_s24 = sadd.s32 1, %s3397_s24  }
 0x44d   : > { %p14_p5 = scmp.ge.s32.totalorder %s17_s24, 4  }
 0x44f   :  { %16 = sbr.rel (!%p14_p5) target bundleno = 1 (0x1), region = 82 }

</bundles_post_ra>
